<compile_context>
chip_gen: v7x
topology: tpu7x:2x2x1
jax: 0.10.0
libtpu: 0.0.40
codegen_flags: <defaults>
</compile_context>

<pallas_src>
import functools

import numpy as np

import jax
import jax.numpy as jnp
from jax.experimental import pallas as pl
from jax.experimental.pallas import tpu as pltpu

_LANE = 128
_SUBLANE = 8


def _rup(x, m):
    return (x + m - 1) // m * m


# --------------------------------------------------------------------------
# Fused kernel body
# --------------------------------------------------------------------------
def _make_vae_kernel(pre_acts, post_acts, use_inkernel_rng):
    """Ref order: rng (SMEM seed or VMEM eps), x, (w,b) per pre-latent layer,
    (w_mu,b_mu), (w_lv,b_lv), (w,b) per post-latent layer, then outputs
    (recon, mu, logvar)."""
    n_pre, n_post = len(pre_acts), len(post_acts)

    def kernel(*refs):
        rng_ref, x_ref = refs[0], refs[1]
        w_refs = refs[2:2 + 2 * (n_pre + 2 + n_post)]
        recon_ref, mu_ref, lv_ref = refs[-3:]

        def dense(x, w_ref, b_ref, act):
            w = w_ref[...]
            # bf16 only on the MXU operands; accumulate + epilogue in f32.
            y = jnp.dot(x.astype(w.dtype), w,
                        preferred_element_type=jnp.float32)
            y = y + b_ref[...]
            if act == "relu":
                y = jnp.maximum(y, 0.0)
            elif act == "silu":
                y = y * jax.nn.sigmoid(y)
            return y

        pos = 0

        def next_wb():
            nonlocal pos
            w, b = w_refs[pos], w_refs[pos + 1]
            pos += 2
            return w, b

        # Encoder (conv layers are prepared as dense spatial matmuls).
        h = x_ref[...]
        for act in pre_acts:
            w, b = next_wb()
            h = dense(h, w, b, act)

        # Diagonal-Gaussian head: two lane-padded heads, no column split.
        w_mu, b_mu = next_wb()
        w_lv, b_lv = next_wb()
        mu = dense(h, w_mu, b_mu, None)
        logvar = dense(h, w_lv, b_lv, None)
        mu_ref[...] = mu
        lv_ref[...] = logvar

        # Reparameterization (exp unclamped, matching the PyTorch module).
        if use_inkernel_rng:
            pltpu.prng_seed(rng_ref[0])
            eps = pltpu.stateful_normal(mu.shape, jnp.float32)
        else:
            eps = rng_ref[...]
        z = mu + eps * jnp.exp(0.5 * logvar)
        # z's padding lanes hold raw eps; the zero rows of the first decoder
        # weight (prepared that way) kill them, so no masking is needed.

        # Decoder.
        d = z
        for act in post_acts:
            w, b = next_wb()
            d = dense(d, w, b, act)
        recon_ref[...] = d

    return kernel


def _probe_inkernel_rng():
    """Feature/lowering probe for the stateful TPU PRNG path."""
    if not (hasattr(pltpu, "prng_seed") and hasattr(pltpu, "stateful_normal")):
        return False

    def k(seed_ref, o_ref):
        pltpu.prng_seed(seed_ref[0])
        o_ref[...] = pltpu.stateful_normal(o_ref.shape, jnp.float32)

    try:
        out = pl.pallas_call(
            k,
            out_shape=jax.ShapeDtypeStruct((8, 128), jnp.float32),
            in_specs=[pl.BlockSpec(memory_space=pltpu.MemorySpace.SMEM)],
            out_specs=pl.BlockSpec(memory_space=pltpu.MemorySpace.VMEM),
        )(jnp.array([0], jnp.int32))
        jax.block_until_ready(out)
        return True
    except Exception:
        return False


# --------------------------------------------------------------------------
# Parameter construction (PyTorch layouts)
# --------------------------------------------------------------------------
def _dense_init(key, fin, fout):
    k1, k2 = jax.random.split(key)
    w = jax.random.normal(k1, (fin, fout), jnp.float32) / jnp.sqrt(float(fin))
    b = 0.01 * jax.random.normal(k2, (fout,), jnp.float32)
    return {"w": w, "b": b}


def _conv_init(key, cout, cin, k):
    k1, k2 = jax.random.split(key)
    w = jax.random.normal(k1, (cout, cin, k), jnp.float32) / jnp.sqrt(float(cin * k))
    b = 0.01 * jax.random.normal(k2, (cout,), jnp.float32)
    return {"w": w, "b": b}


def _convT_init(key, cin, cout, k):
    k1, k2 = jax.random.split(key)
    w = jax.random.normal(k1, (cin, cout, k), jnp.float32) / jnp.sqrt(float(cin * k))
    b = 0.01 * jax.random.normal(k2, (cout,), jnp.float32)
    return {"w": w, "b": b}


def init_vae_params(key, *, input_dim, base_channels, num_downsamples,
                    hidden_dim, latent_dim):
    keys = iter(jax.random.split(key, 64))
    params = {}

    enc_convs = []
    in_ch, out_ch, cur = 1, base_channels, input_dim
    for _ in range(num_downsamples):
        enc_convs.append(_conv_init(next(keys), out_ch, in_ch, 3))
        cur //= 2
        in_ch, out_ch = out_ch, out_ch * 2
    final_channels, final_spatial = in_ch, cur
    params["enc_convs"] = enc_convs
    fc_in = final_channels * final_spatial
    params["enc_fc1"] = _dense_init(next(keys), fc_in, 512)
    params["enc_fc2"] = _dense_init(next(keys), 512, 256)
    params["enc_fc3"] = _dense_init(next(keys), 256, hidden_dim)

    params["fc_mu"] = _dense_init(next(keys), hidden_dim, latent_dim)
    params["fc_logvar"] = _dense_init(next(keys), hidden_dim, latent_dim)

    params["dec_fc1"] = _dense_init(next(keys), latent_dim, 512)
    params["dec_fc2"] = _dense_init(next(keys), 512, 256)
    params["dec_fc3"] = _dense_init(next(keys), 256, 128)
    params["dec_fc4"] = _dense_init(next(keys), 128, final_channels * final_spatial)
    dec_convs = []
    in_ch, out_ch = final_channels, final_channels // 2
    for _ in range(num_downsamples):
        dec_convs.append(_convT_init(next(keys), in_ch, out_ch, 3))
        in_ch, out_ch = out_ch, max(out_ch // 2, 1)
    params["dec_convs"] = dec_convs
    params["final_conv"] = _conv_init(next(keys), 1, in_ch, 3)

    meta = {"final_channels": final_channels, "final_spatial": final_spatial}
    return params, meta


# --------------------------------------------------------------------------
# Prepare-time conversion: convs -> dense spatial matrices, lane/row padding
# --------------------------------------------------------------------------
def _conv1d_matrix(w, b, lin, stride, padding):
    """Conv1d as a dense [Cin*Lin, Cout*Lout] matrix (PyTorch NCL flatten)."""
    w = np.asarray(w, np.float32)
    b = np.asarray(b, np.float32)
    cout, cin, k = w.shape
    lout = (lin + 2 * padding - k) // stride + 1
    m = np.zeros((cin * lin, cout * lout), np.float32)
    for co in range(cout):
        for ci in range(cin):
            for t in range(k):
                for lo in range(lout):
                    li = stride * lo + t - padding
                    if 0 <= li < lin:
                        m[ci * lin + li, co * lout + lo] += w[co, ci, t]
    return m, np.repeat(b, lout), lout


def _convT1d_matrix(w, b, lin, stride, padding, output_padding):
    """ConvTranspose1d as a dense [Cin*Lin, Cout*Lout] matrix (NCL flatten)."""
    w = np.asarray(w, np.float32)
    b = np.asarray(b, np.float32)
    cin, cout, k = w.shape
    lout = (lin - 1) * stride - 2 * padding + k + output_padding
    m = np.zeros((cin * lin, cout * lout), np.float32)
    for ci in range(cin):
        for co in range(cout):
            for t in range(k):
                for li in range(lin):
                    lo = stride * li + t - padding
                    if 0 <= lo < lout:
                        m[ci * lin + li, co * lout + lo] += w[ci, co, t]
    return m, np.repeat(b, lout), lout


def _prep_layer(w, b, k_pad, dtype):
    """Zero-pad [fin,fout] weight to [k_pad, rup(fout,128)], bias to
    [1, rup(fout,128)].  Extra rows/cols are zero so padding lanes of the
    carried activation stay zero (and dead input lanes contribute nothing)."""
    w = np.asarray(w, np.float32)
    b = np.asarray(b, np.float32).reshape(-1)
    fin, fout = w.shape
    assert fin <= k_pad
    n_pad = _rup(fout, _LANE)
    wp = np.zeros((k_pad, n_pad), np.float32)
    wp[:fin, :fout] = w
    bp = np.zeros((1, n_pad), np.float32)
    bp[0, :fout] = b
    return jnp.asarray(wp, dtype), jnp.asarray(bp, jnp.float32), n_pad


def prepare_params(params, meta, *, input_dim, latent_dim, batch):
    C, S = meta["final_channels"], meta["final_spatial"]
    mp = _rup(max(batch, 1), 16)            # 16 rows: bf16 sublane packing
    in_pad = _rup(input_dim, _SUBLANE)      # K of the first matmul

    flat, pre_acts, post_acts = [], [], []

    # ---- encoder convs (ReLU) ----
    kp, lin = in_pad, input_dim
    for i, p in enumerate(params["enc_convs"]):
        m, bias, lin = _conv1d_matrix(p["w"], p["b"], lin, stride=2, padding=1)
        dt = jnp.float32 if i == 0 else jnp.bfloat16   # Cin=1 first conv in f32
        w, b, kp = _prep_layer(m, bias, kp, dt)
        flat += [w, b]
        pre_acts.append("relu")
    assert lin == S

    # ---- encoder MLP (SiLU) ----
    for name in ("enc_fc1", "enc_fc2", "enc_fc3"):
        w, b, kp = _prep_layer(params[name]["w"], params[name]["b"], kp,
                               jnp.bfloat16)
        flat += [w, b]
        pre_acts.append("silu")

    # ---- mu / logvar heads (f32, lane-padded) ----
    w_mu, b_mu, lat_pad = _prep_layer(params["fc_mu"]["w"],
                                      params["fc_mu"]["b"], kp, jnp.float32)
    w_lv, b_lv, _ = _prep_layer(params["fc_logvar"]["w"],
                                params["fc_logvar"]["b"], kp, jnp.float32)
    flat += [w_mu, b_mu, w_lv, b_lv]

    # ---- decoder MLP (zero rows beyond latent_dim kill eps padding lanes) --
    kp = lat_pad
    for name, act in (("dec_fc1", "silu"), ("dec_fc2", "silu"),
                      ("dec_fc3", "silu"), ("dec_fc4", None)):
        w, b, kp = _prep_layer(params[name]["w"], params[name]["b"], kp,
                               jnp.bfloat16)
        flat += [w, b]
        post_acts.append(act)

    # ---- decoder ConvTranspose stack (ReLU) ----
    lin = S
    for p in params["dec_convs"]:
        m, bias, lin = _convT1d_matrix(p["w"], p["b"], lin, 2, 1, 1)
        w, b, kp = _prep_layer(m, bias, kp, jnp.bfloat16)
        flat += [w, b]
        post_acts.append("relu")

    # ---- final conv (no activation) ----
    m, bias, lin = _conv1d_matrix(params["final_conv"]["w"],
                                  params["final_conv"]["b"], lin, 1, 1)
    assert lin == input_dim
    w, b, out_pad = _prep_layer(m, bias, kp, jnp.bfloat16)
    flat += [w, b]
    post_acts.append(None)

    use_rng = _probe_inkernel_rng()
    kernel = _make_vae_kernel(tuple(pre_acts), tuple(post_acts), use_rng)
    return {
        "kernel": kernel,
        "weights": flat,
        "mp": mp,
        "in_pad": in_pad,
        "out_pad": out_pad,
        "lat_pad": lat_pad,
        "input_dim": input_dim,
        "latent_dim": latent_dim,
        "use_inkernel_rng": use_rng,
    }


# --------------------------------------------------------------------------
# VAE forward (mirrors VAE.forward with dist_type='diagonal')
# --------------------------------------------------------------------------
def vae_forward(prep, x, seed):
    B = x.shape[0]
    L = prep["input_dim"]
    mp, lat = prep["mp"], prep["latent_dim"]

    xin = x.reshape(B, L).astype(jnp.float32)                 # NCL, Cin == 1
    xin = jnp.pad(xin, ((0, mp - B), (0, prep["in_pad"] - L)))

    vmem = pl.BlockSpec(memory_space=pltpu.MemorySpace.VMEM)
    if prep["use_inkernel_rng"]:
        rng_arg = jnp.asarray(seed, jnp.int32).reshape((1,))
        rng_spec = pl.BlockSpec(memory_space=pltpu.MemorySpace.SMEM)
    else:
        # Fallback for JAX builds without the stateful in-kernel PRNG:
        # eps is drawn outside and DMA'd in as one tiny VMEM input.
        key = jax.random.PRNGKey(jnp.asarray(seed, jnp.int32).reshape(()))
        rng_arg = jax.random.normal(key, (mp, prep["lat_pad"]), jnp.float32)
        rng_spec = vmem

    args = [rng_arg, xin] + list(prep["weights"])

    # Single program, no grid.  TODO(synk): for scaled-up configs add a
    # leading row-block grid axis marked "parallel" (v7x dual TC) and stream
    # the FC weights with pl.Buffered instead of keeping them all resident.
    recon, mu, logvar = pl.pallas_call(
        prep["kernel"],
        out_shape=(
            jax.ShapeDtypeStruct((mp, prep["out_pad"]), jnp.float32),
            jax.ShapeDtypeStruct((mp, prep["lat_pad"]), jnp.float32),
            jax.ShapeDtypeStruct((mp, prep["lat_pad"]), jnp.float32),
        ),
        in_specs=[rng_spec] + [vmem] * (len(args) - 1),
        out_specs=(vmem, vmem, vmem),
    )(*args)

    x_recon = recon[:B, :L].reshape(B, 1, L)                  # NLC slab -> NCL
    return x_recon, (mu[:B, :lat], logvar[:B, :lat])


# --------------------------------------------------------------------------
# Plain-JAX f32 reference of the deterministic (eps-independent) path
# --------------------------------------------------------------------------
def reference_mu_logvar(params, x):
    h = x.astype(jnp.float32)
    for p in params["enc_convs"]:
        h = jax.lax.conv_general_dilated(
            h, p["w"], window_strides=(2,), padding=[(1, 1)],
            dimension_numbers=("NCH", "OIH", "NCH"))
        h = jnp.maximum(h + p["b"][None, :, None], 0.0)
    h = h.reshape(h.shape[0], -1)
    for name in ("enc_fc1", "enc_fc2", "enc_fc3"):
        h = jax.nn.silu(h @ params[name]["w"] + params[name]["b"])
    mu = h @ params["fc_mu"]["w"] + params["fc_mu"]["b"]
    logvar = h @ params["fc_logvar"]["w"] + params["fc_logvar"]["b"]
    return mu, logvar


# --------------------------------------------------------------------------
if __name__ == "__main__":
    INPUT_DIM = 64
    BASE_CHANNELS = 4
    NUM_DOWNSAMPLES = 2
    HIDDEN_DIM = 32
    LATENT_DIM = 16
    BATCH = 2

    key = jax.random.PRNGKey(0)
    k_params, k_data = jax.random.split(key)

    params, meta = init_vae_params(
        k_params,
        input_dim=INPUT_DIM,
        base_channels=BASE_CHANNELS,
        num_downsamples=NUM_DOWNSAMPLES,
        hidden_dim=HIDDEN_DIM,
        latent_dim=LATENT_DIM,
    )
    prep = prepare_params(params, meta, input_dim=INPUT_DIM,
                          latent_dim=LATENT_DIM, batch=BATCH)

    x = jax.random.normal(k_data, (BATCH, 1, INPUT_DIM), jnp.float32)   # NCL
    seed = jnp.array([1234], dtype=jnp.int32)

    fwd = jax.jit(functools.partial(vae_forward, prep))
    x_recon, (mu, logvar) = fwd(x, seed)
    jax.block_until_ready(x_recon)
    jax.block_until_ready(mu)
    jax.block_until_ready(logvar)

    assert x_recon.shape == (BATCH, 1, INPUT_DIM), x_recon.shape
    assert mu.shape == (BATCH, LATENT_DIM) and logvar.shape == (BATCH, LATENT_DIM)
    assert bool(jnp.all(jnp.isfinite(x_recon)))
    assert bool(jnp.all(jnp.isfinite(mu))) and bool(jnp.all(jnp.isfinite(logvar)))

    # eps-independent encoder + head path cross-checked against a plain-JAX
    # f32 reference (loose tolerance covers the bf16 MXU operands).
    mu_ref, logvar_ref = reference_mu_logvar(params, x)
    assert jnp.allclose(mu, mu_ref, atol=3e-2, rtol=3e-2), \
        float(jnp.max(jnp.abs(mu - mu_ref)))
    assert jnp.allclose(logvar, logvar_ref, atol=3e-2, rtol=3e-2), \
        float(jnp.max(jnp.abs(logvar - logvar_ref)))

    print("KERNEL_OK")
</pallas_src>

<mosaic_0001>
module attributes {stable_mosaic.version = 11 : i64} {
  func.func @k(%arg0: memref<1xi32, #tpu.memory_space<smem>>, %arg1: memref<8x128xf32, #tpu.memory_space<vmem>>) attributes {dimension_semantics = [], scalar_prefetch = 0 : i64, scratch_operands = 0 : i64, tpu.core_type = #tpu.core_type<tc>} {
    %c0 = arith.constant 0 : index
    %0 = memref.load %arg0[%c0] : memref<1xi32, #tpu.memory_space<smem>>
    "tpu.prng_set_seed_32"(%0) : (i32) -> ()
    %c0_i32 = arith.constant 0 : i32
    %c0_i32_0 = arith.constant 0 : i32
    %cst = arith.constant -0.99999994 : f32
    %cst_1 = arith.constant 1.000000e+00 : f32
    %1 = vector.broadcast %cst : f32 to vector<1x1xf32>
    %2 = vector.broadcast %cst_1 : f32 to vector<1x1xf32>
    %3 = "tpu.prng_random_bits"() : () -> vector<8x128xi32>
    %c9_i32 = arith.constant 9 : i32
    %4 = vector.broadcast %c9_i32 : i32 to vector<8x128xi32>
    %5 = arith.shrui %3, %4 : vector<8x128xi32>
    %c1065353216_i32 = arith.constant 1065353216 : i32
    %6 = vector.broadcast %c1065353216_i32 : i32 to vector<8x128xi32>
    %7 = arith.ori %5, %6 : vector<8x128xi32>
    %8 = tpu.bitcast %7 : vector<8x128xi32> -> vector<8x128xf32>
    %cst_2 = arith.constant 1.000000e+00 : f32
    %9 = vector.broadcast %cst_2 : f32 to vector<8x128xf32>
    %10 = arith.subf %8, %9 : vector<8x128xf32>
    %11 = arith.subf %2, %1 : vector<1x1xf32>
    %12 = vector.broadcast %11 : vector<1x1xf32> to vector<8x128xf32>
    %13 = arith.mulf %10, %12 : vector<8x128xf32>
    %14 = vector.broadcast %1 : vector<1x1xf32> to vector<8x128xf32>
    %15 = arith.addf %13, %14 : vector<8x128xf32>
    %16 = vector.broadcast %1 : vector<1x1xf32> to vector<8x128xf32>
    %17 = arith.maximumf %16, %15 : vector<8x128xf32>
    %cst_3 = arith.constant 0.000000e+00 : f32
    %18 = vector.broadcast %cst_3 : f32 to vector<8x128xf32>
    %19 = arith.subf %18, %17 : vector<8x128xf32>
    %20 = arith.mulf %17, %19 : vector<8x128xf32>
    %21 = math.log1p %20 : vector<8x128xf32>
    %cst_4 = arith.constant 0.000000e+00 : f32
    %22 = vector.broadcast %cst_4 : f32 to vector<8x128xf32>
    %23 = arith.subf %22, %21 : vector<8x128xf32>
    %cst_5 = arith.constant 5.000000e+00 : f32
    %24 = vector.broadcast %cst_5 : f32 to vector<8x128xf32>
    %25 = arith.cmpf olt, %23, %24 : vector<8x128xf32>
    %cst_6 = arith.constant 2.500000e+00 : f32
    %26 = vector.broadcast %cst_6 : f32 to vector<8x128xf32>
    %27 = arith.subf %23, %26 : vector<8x128xf32>
    %28 = math.sqrt %23 : vector<8x128xf32>
    %cst_7 = arith.constant 3.000000e+00 : f32
    %29 = vector.broadcast %cst_7 : f32 to vector<8x128xf32>
    %30 = arith.subf %28, %29 : vector<8x128xf32>
    %31 = arith.select %25, %27, %30 : vector<8x128xi1>, vector<8x128xf32>
    %cst_8 = arith.constant 2.81022636E-8 : f32
    %cst_9 = arith.constant -2.00214257E-4 : f32
    %32 = vector.broadcast %cst_8 : f32 to vector<8x128xf32>
    %33 = vector.broadcast %cst_9 : f32 to vector<8x128xf32>
    %34 = arith.select %25, %32, %33 : vector<8x128xi1>, vector<8x128xf32>
    %cst_10 = arith.constant 3.43273939E-7 : f32
    %cst_11 = arith.constant 1.00950558E-4 : f32
    %35 = vector.broadcast %cst_10 : f32 to vector<8x128xf32>
    %36 = vector.broadcast %cst_11 : f32 to vector<8x128xf32>
    %37 = arith.select %25, %35, %36 : vector<8x128xi1>, vector<8x128xf32>
    %38 = arith.mulf %34, %31 : vector<8x128xf32>
    %39 = arith.addf %37, %38 : vector<8x128xf32>
    %cst_12 = arith.constant -3.5233877E-6 : f32
    %cst_13 = arith.constant 0.00134934322 : f32
    %40 = vector.broadcast %cst_12 : f32 to vector<8x128xf32>
    %41 = vector.broadcast %cst_13 : f32 to vector<8x128xf32>
    %42 = arith.select %25, %40, %41 : vector<8x128xi1>, vector<8x128xf32>
    %43 = arith.mulf %39, %31 : vector<8x128xf32>
    %44 = arith.addf %42, %43 : vector<8x128xf32>
    %cst_14 = arith.constant -4.39150654E-6 : f32
    %cst_15 = arith.constant -0.00367342844 : f32
    %45 = vector.broadcast %cst_14 : f32 to vector<8x128xf32>
    %46 = vector.broadcast %cst_15 : f32 to vector<8x128xf32>
    %47 = arith.select %25, %45, %46 : vector<8x128xi1>, vector<8x128xf32>
    %48 = arith.mulf %44, %31 : vector<8x128xf32>
    %49 = arith.addf %47, %48 : vector<8x128xf32>
    %cst_16 = arith.constant 2.1858087E-4 : f32
    %cst_17 = arith.constant 0.00573950773 : f32
    %50 = vector.broadcast %cst_16 : f32 to vector<8x128xf32>
    %51 = vector.broadcast %cst_17 : f32 to vector<8x128xf32>
    %52 = arith.select %25, %50, %51 : vector<8x128xi1>, vector<8x128xf32>
    %53 = arith.mulf %49, %31 : vector<8x128xf32>
    %54 = arith.addf %52, %53 : vector<8x128xf32>
    %cst_18 = arith.constant -0.00125372503 : f32
    %cst_19 = arith.constant -0.0076224613 : f32
    %55 = vector.broadcast %cst_18 : f32 to vector<8x128xf32>
    %56 = vector.broadcast %cst_19 : f32 to vector<8x128xf32>
    %57 = arith.select %25, %55, %56 : vector<8x128xi1>, vector<8x128xf32>
    %58 = arith.mulf %54, %31 : vector<8x128xf32>
    %59 = arith.addf %57, %58 : vector<8x128xf32>
    %cst_20 = arith.constant -0.00417768164 : f32
    %cst_21 = arith.constant 0.00943887047 : f32
    %60 = vector.broadcast %cst_20 : f32 to vector<8x128xf32>
    %61 = vector.broadcast %cst_21 : f32 to vector<8x128xf32>
    %62 = arith.select %25, %60, %61 : vector<8x128xi1>, vector<8x128xf32>
    %63 = arith.mulf %59, %31 : vector<8x128xf32>
    %64 = arith.addf %62, %63 : vector<8x128xf32>
    %cst_22 = arith.constant 0.246640727 : f32
    %cst_23 = arith.constant 1.00167406 : f32
    %65 = vector.broadcast %cst_22 : f32 to vector<8x128xf32>
    %66 = vector.broadcast %cst_23 : f32 to vector<8x128xf32>
    %67 = arith.select %25, %65, %66 : vector<8x128xi1>, vector<8x128xf32>
    %68 = arith.mulf %64, %31 : vector<8x128xf32>
    %69 = arith.addf %67, %68 : vector<8x128xf32>
    %cst_24 = arith.constant 1.50140941 : f32
    %cst_25 = arith.constant 2.83297682 : f32
    %70 = vector.broadcast %cst_24 : f32 to vector<8x128xf32>
    %71 = vector.broadcast %cst_25 : f32 to vector<8x128xf32>
    %72 = arith.select %25, %70, %71 : vector<8x128xi1>, vector<8x128xf32>
    %73 = arith.mulf %69, %31 : vector<8x128xf32>
    %74 = arith.addf %72, %73 : vector<8x128xf32>
    %75 = math.absf %17 : vector<8x128xf32>
    %cst_26 = arith.constant 1.000000e+00 : f32
    %76 = vector.broadcast %cst_26 : f32 to vector<8x128xf32>
    %77 = arith.cmpf oeq, %75, %76 : vector<8x128xf32>
    %cst_27 = arith.constant 0x7F800000 : f32
    %78 = vector.broadcast %cst_27 : f32 to vector<8x128xf32>
    %79 = arith.mulf %78, %17 : vector<8x128xf32>
    %80 = arith.mulf %74, %17 : vector<8x128xf32>
    %81 = arith.select %77, %79, %80 : vector<8x128xi1>, vector<8x128xf32>
    %cst_28 = arith.constant 1.41421354 : f32
    %82 = vector.broadcast %cst_28 : f32 to vector<8x128xf32>
    %83 = arith.mulf %82, %81 : vector<8x128xf32>
    %c0_29 = arith.constant 0 : index
    %c0_30 = arith.constant 0 : index
    %84 = vector.load %arg1[%c0_29, %c0_30] : memref<8x128xf32, #tpu.memory_space<vmem>>, vector<8x128xf32>
    tpu.vector_store %arg1[%c0_29, %c0_30], %83 {strides = array<i32>} : memref<8x128xf32, #tpu.memory_space<vmem>>, vector<8x128xf32>,
    return
  }
}

module attributes {stable_mosaic.version = 11 : i64} {
  func.func @kernel(%arg0: memref<16x128xf32, #tpu.memory_space<vmem>>, %arg1: memref<16x64xf32, #tpu.memory_space<vmem>>, %arg2: memref<64x128xf32, #tpu.memory_space<vmem>>, %arg3: memref<1x128xf32, #tpu.memory_space<vmem>>, %arg4: memref<128x128xbf16, #tpu.memory_space<vmem>>, %arg5: memref<1x128xf32, #tpu.memory_space<vmem>>, %arg6: memref<128x512xbf16, #tpu.memory_space<vmem>>, %arg7: memref<1x512xf32, #tpu.memory_space<vmem>>, %arg8: memref<512x256xbf16, #tpu.memory_space<vmem>>, %arg9: memref<1x256xf32, #tpu.memory_space<vmem>>, %arg10: memref<256x128xbf16, #tpu.memory_space<vmem>>, %arg11: memref<1x128xf32, #tpu.memory_space<vmem>>, %arg12: memref<128x128xf32, #tpu.memory_space<vmem>>, %arg13: memref<1x128xf32, #tpu.memory_space<vmem>>, %arg14: memref<128x128xf32, #tpu.memory_space<vmem>>, %arg15: memref<1x128xf32, #tpu.memory_space<vmem>>, %arg16: memref<128x512xbf16, #tpu.memory_space<vmem>>, %arg17: memref<1x512xf32, #tpu.memory_space<vmem>>, %arg18: memref<512x256xbf16, #tpu.memory_space<vmem>>, %arg19: memref<1x256xf32, #tpu.memory_space<vmem>>, %arg20: memref<256x128xbf16, #tpu.memory_space<vmem>>, %arg21: memref<1x128xf32, #tpu.memory_space<vmem>>, %arg22: memref<128x128xbf16, #tpu.memory_space<vmem>>, %arg23: memref<1x128xf32, #tpu.memory_space<vmem>>, %arg24: memref<128x128xbf16, #tpu.memory_space<vmem>>, %arg25: memref<1x128xf32, #tpu.memory_space<vmem>>, %arg26: memref<128x128xbf16, #tpu.memory_space<vmem>>, %arg27: memref<1x128xf32, #tpu.memory_space<vmem>>, %arg28: memref<128x128xbf16, #tpu.memory_space<vmem>>, %arg29: memref<1x128xf32, #tpu.memory_space<vmem>>, %arg30: memref<16x128xf32, #tpu.memory_space<vmem>>, %arg31: memref<16x128xf32, #tpu.memory_space<vmem>>, %arg32: memref<16x128xf32, #tpu.memory_space<vmem>>) attributes {dimension_semantics = [], scalar_prefetch = 0 : i64, scratch_operands = 0 : i64, tpu.core_type = #tpu.core_type<tc>} {
    %c0 = arith.constant 0 : index
    %c0_0 = arith.constant 0 : index
    %0 = vector.load %arg1[%c0, %c0_0] : memref<16x64xf32, #tpu.memory_space<vmem>>, vector<16x64xf32>
    %c0_1 = arith.constant 0 : index
    %c0_2 = arith.constant 0 : index
    %1 = vector.load %arg2[%c0_1, %c0_2] : memref<64x128xf32, #tpu.memory_space<vmem>>, vector<64x128xf32>
    %cst = arith.constant dense<0.000000e+00> : vector<16x128xf32>
    %2 = tpu.matmul %0, %1, %cst {dimension_numbers = #tpu.dot_dimension_numbers<[1], [0], [0], [1], [0, 0, 1, 1], [], []>} : vector<16x64xf32>, vector<64x128xf32>, vector<16x128xf32> -> vector<16x128xf32>
    %c0_3 = arith.constant 0 : index
    %c0_4 = arith.constant 0 : index
    %3 = vector.load %arg3[%c0_3, %c0_4] : memref<1x128xf32, #tpu.memory_space<vmem>>, vector<1x128xf32>
    %4 = vector.broadcast %3 : vector<1x128xf32> to vector<16x128xf32>
    %5 = arith.addf %2, %4 : vector<16x128xf32>
    %cst_5 = arith.constant 0.000000e+00 : f32
    %6 = vector.broadcast %cst_5 : f32 to vector<16x128xf32>
    %7 = arith.maximumf %5, %6 : vector<16x128xf32>
    %c0_6 = arith.constant 0 : index
    %c0_7 = arith.constant 0 : index
    %8 = vector.load %arg4[%c0_6, %c0_7] : memref<128x128xbf16, #tpu.memory_space<vmem>>, vector<128x128xbf16>
    %9 = arith.truncf %7 : vector<16x128xf32> to vector<16x128xbf16>
    %cst_8 = arith.constant dense<0.000000e+00> : vector<16x128xf32>
    %10 = tpu.matmul %9, %8, %cst_8 {dimension_numbers = #tpu.dot_dimension_numbers<[1], [0], [0], [1], [0, 0, 1, 1], [], []>} : vector<16x128xbf16>, vector<128x128xbf16>, vector<16x128xf32> -> vector<16x128xf32>
    %c0_9 = arith.constant 0 : index
    %c0_10 = arith.constant 0 : index
    %11 = vector.load %arg5[%c0_9, %c0_10] : memref<1x128xf32, #tpu.memory_space<vmem>>, vector<1x128xf32>
    %12 = vector.broadcast %11 : vector<1x128xf32> to vector<16x128xf32>
    %13 = arith.addf %10, %12 : vector<16x128xf32>
    %cst_11 = arith.constant 0.000000e+00 : f32
    %14 = vector.broadcast %cst_11 : f32 to vector<16x128xf32>
    %15 = arith.maximumf %13, %14 : vector<16x128xf32>
    %c0_12 = arith.constant 0 : index
    %c0_13 = arith.constant 0 : index
    %16 = vector.load %arg6[%c0_12, %c0_13] : memref<128x512xbf16, #tpu.memory_space<vmem>>, vector<128x512xbf16>
    %17 = arith.truncf %15 : vector<16x128xf32> to vector<16x128xbf16>
    %cst_14 = arith.constant dense<0.000000e+00> : vector<16x512xf32>
    %18 = tpu.matmul %17, %16, %cst_14 {dimension_numbers = #tpu.dot_dimension_numbers<[1], [0], [0], [1], [0, 0, 1, 1], [], []>} : vector<16x128xbf16>, vector<128x512xbf16>, vector<16x512xf32> -> vector<16x512xf32>
    %c0_15 = arith.constant 0 : index
    %c0_16 = arith.constant 0 : index
    %19 = vector.load %arg7[%c0_15, %c0_16] : memref<1x512xf32, #tpu.memory_space<vmem>>, vector<1x512xf32>
    %20 = vector.broadcast %19 : vector<1x512xf32> to vector<16x512xf32>
    %21 = arith.addf %18, %20 : vector<16x512xf32>
    %22 = arith.negf %21 : vector<16x512xf32>
    %23 = math.exp %22 : vector<16x512xf32>
    %cst_17 = arith.constant 1.000000e+00 : f32
    %24 = vector.broadcast %cst_17 : f32 to vector<16x512xf32>
    %25 = arith.addf %24, %23 : vector<16x512xf32>
    %26 = arith.divf %24, %25 : vector<16x512xf32>
    %27 = arith.mulf %21, %26 : vector<16x512xf32>
    %c0_18 = arith.constant 0 : index
    %c0_19 = arith.constant 0 : index
    %28 = vector.load %arg8[%c0_18, %c0_19] : memref<512x256xbf16, #tpu.memory_space<vmem>>, vector<512x256xbf16>
    %29 = arith.truncf %27 : vector<16x512xf32> to vector<16x512xbf16>
    %cst_20 = arith.constant dense<0.000000e+00> : vector<16x256xf32>
    %30 = tpu.matmul %29, %28, %cst_20 {dimension_numbers = #tpu.dot_dimension_numbers<[1], [0], [0], [1], [0, 0, 1, 1], [], []>} : vector<16x512xbf16>, vector<512x256xbf16>, vector<16x256xf32> -> vector<16x256xf32>
    %c0_21 = arith.constant 0 : index
    %c0_22 = arith.constant 0 : index
    %31 = vector.load %arg9[%c0_21, %c0_22] : memref<1x256xf32, #tpu.memory_space<vmem>>, vector<1x256xf32>
    %32 = vector.broadcast %31 : vector<1x256xf32> to vector<16x256xf32>
    %33 = arith.addf %30, %32 : vector<16x256xf32>
    %34 = arith.negf %33 : vector<16x256xf32>
    %35 = math.exp %34 : vector<16x256xf32>
    %cst_23 = arith.constant 1.000000e+00 : f32
    %36 = vector.broadcast %cst_23 : f32 to vector<16x256xf32>
    %37 = arith.addf %36, %35 : vector<16x256xf32>
    %38 = arith.divf %36, %37 : vector<16x256xf32>
    %39 = arith.mulf %33, %38 : vector<16x256xf32>
    %c0_24 = arith.constant 0 : index
    %c0_25 = arith.constant 0 : index
    %40 = vector.load %arg10[%c0_24, %c0_25] : memref<256x128xbf16, #tpu.memory_space<vmem>>, vector<256x128xbf16>
    %41 = arith.truncf %39 : vector<16x256xf32> to vector<16x256xbf16>
    %cst_26 = arith.constant dense<0.000000e+00> : vector<16x128xf32>
    %42 = tpu.matmul %41, %40, %cst_26 {dimension_numbers = #tpu.dot_dimension_numbers<[1], [0], [0], [1], [0, 0, 1, 1], [], []>} : vector<16x256xbf16>, vector<256x128xbf16>, vector<16x128xf32> -> vector<16x128xf32>
    %c0_27 = arith.constant 0 : index
    %c0_28 = arith.constant 0 : index
    %43 = vector.load %arg11[%c0_27, %c0_28] : memref<1x128xf32, #tpu.memory_space<vmem>>, vector<1x128xf32>
    %44 = vector.broadcast %43 : vector<1x128xf32> to vector<16x128xf32>
    %45 = arith.addf %42, %44 : vector<16x128xf32>
    %46 = arith.negf %45 : vector<16x128xf32>
    %47 = math.exp %46 : vector<16x128xf32>
    %cst_29 = arith.constant 1.000000e+00 : f32
    %48 = vector.broadcast %cst_29 : f32 to vector<16x128xf32>
    %49 = arith.addf %48, %47 : vector<16x128xf32>
    %50 = arith.divf %48, %49 : vector<16x128xf32>
    %51 = arith.mulf %45, %50 : vector<16x128xf32>
    %c0_30 = arith.constant 0 : index
    %c0_31 = arith.constant 0 : index
    %52 = vector.load %arg12[%c0_30, %c0_31] : memref<128x128xf32, #tpu.memory_space<vmem>>, vector<128x128xf32>
    %cst_32 = arith.constant dense<0.000000e+00> : vector<16x128xf32>
    %53 = tpu.matmul %51, %52, %cst_32 {dimension_numbers = #tpu.dot_dimension_numbers<[1], [0], [0], [1], [0, 0, 1, 1], [], []>} : vector<16x128xf32>, vector<128x128xf32>, vector<16x128xf32> -> vector<16x128xf32>
    %c0_33 = arith.constant 0 : index
    %c0_34 = arith.constant 0 : index
    %54 = vector.load %arg13[%c0_33, %c0_34] : memref<1x128xf32, #tpu.memory_space<vmem>>, vector<1x128xf32>
    %55 = vector.broadcast %54 : vector<1x128xf32> to vector<16x128xf32>
    %56 = arith.addf %53, %55 : vector<16x128xf32>
    %c0_35 = arith.constant 0 : index
    %c0_36 = arith.constant 0 : index
    %57 = vector.load %arg14[%c0_35, %c0_36] : memref<128x128xf32, #tpu.memory_space<vmem>>, vector<128x128xf32>
    %cst_37 = arith.constant dense<0.000000e+00> : vector<16x128xf32>
    %58 = tpu.matmul %51, %57, %cst_37 {dimension_numbers = #tpu.dot_dimension_numbers<[1], [0], [0], [1], [0, 0, 1, 1], [], []>} : vector<16x128xf32>, vector<128x128xf32>, vector<16x128xf32> -> vector<16x128xf32>
    %c0_38 = arith.constant 0 : index
    %c0_39 = arith.constant 0 : index
    %59 = vector.load %arg15[%c0_38, %c0_39] : memref<1x128xf32, #tpu.memory_space<vmem>>, vector<1x128xf32>
    %60 = vector.broadcast %59 : vector<1x128xf32> to vector<16x128xf32>
    %61 = arith.addf %58, %60 : vector<16x128xf32>
    %c0_40 = arith.constant 0 : index
    %c0_41 = arith.constant 0 : index
    %62 = vector.load %arg31[%c0_40, %c0_41] : memref<16x128xf32, #tpu.memory_space<vmem>>, vector<16x128xf32>
    tpu.vector_store %arg31[%c0_40, %c0_41], %56 {strides = array<i32>} : memref<16x128xf32, #tpu.memory_space<vmem>>, vector<16x128xf32>,
    %c0_42 = arith.constant 0 : index
    %c0_43 = arith.constant 0 : index
    %63 = vector.load %arg32[%c0_42, %c0_43] : memref<16x128xf32, #tpu.memory_space<vmem>>, vector<16x128xf32>
    tpu.vector_store %arg32[%c0_42, %c0_43], %61 {strides = array<i32>} : memref<16x128xf32, #tpu.memory_space<vmem>>, vector<16x128xf32>,
    %c0_44 = arith.constant 0 : index
    %c0_45 = arith.constant 0 : index
    %64 = vector.load %arg0[%c0_44, %c0_45] : memref<16x128xf32, #tpu.memory_space<vmem>>, vector<16x128xf32>
    %cst_46 = arith.constant 5.000000e-01 : f32
    %65 = vector.broadcast %cst_46 : f32 to vector<16x128xf32>
    %66 = arith.mulf %65, %61 : vector<16x128xf32>
    %67 = math.exp %66 : vector<16x128xf32>
    %68 = arith.mulf %64, %67 : vector<16x128xf32>
    %69 = arith.addf %56, %68 : vector<16x128xf32>
    %c0_47 = arith.constant 0 : index
    %c0_48 = arith.constant 0 : index
    %70 = vector.load %arg16[%c0_47, %c0_48] : memref<128x512xbf16, #tpu.memory_space<vmem>>, vector<128x512xbf16>
    %71 = arith.truncf %69 : vector<16x128xf32> to vector<16x128xbf16>
    %cst_49 = arith.constant dense<0.000000e+00> : vector<16x512xf32>
    %72 = tpu.matmul %71, %70, %cst_49 {dimension_numbers = #tpu.dot_dimension_numbers<[1], [0], [0], [1], [0, 0, 1, 1], [], []>} : vector<16x128xbf16>, vector<128x512xbf16>, vector<16x512xf32> -> vector<16x512xf32>
    %c0_50 = arith.constant 0 : index
    %c0_51 = arith.constant 0 : index
    %73 = vector.load %arg17[%c0_50, %c0_51] : memref<1x512xf32, #tpu.memory_space<vmem>>, vector<1x512xf32>
    %74 = vector.broadcast %73 : vector<1x512xf32> to vector<16x512xf32>
    %75 = arith.addf %72, %74 : vector<16x512xf32>
    %76 = arith.negf %75 : vector<16x512xf32>
    %77 = math.exp %76 : vector<16x512xf32>
    %cst_52 = arith.constant 1.000000e+00 : f32
    %78 = vector.broadcast %cst_52 : f32 to vector<16x512xf32>
    %79 = arith.addf %78, %77 : vector<16x512xf32>
    %80 = arith.divf %78, %79 : vector<16x512xf32>
    %81 = arith.mulf %75, %80 : vector<16x512xf32>
    %c0_53 = arith.constant 0 : index
    %c0_54 = arith.constant 0 : index
    %82 = vector.load %arg18[%c0_53, %c0_54] : memref<512x256xbf16, #tpu.memory_space<vmem>>, vector<512x256xbf16>
    %83 = arith.truncf %81 : vector<16x512xf32> to vector<16x512xbf16>
    %cst_55 = arith.constant dense<0.000000e+00> : vector<16x256xf32>
    %84 = tpu.matmul %83, %82, %cst_55 {dimension_numbers = #tpu.dot_dimension_numbers<[1], [0], [0], [1], [0, 0, 1, 1], [], []>} : vector<16x512xbf16>, vector<512x256xbf16>, vector<16x256xf32> -> vector<16x256xf32>
    %c0_56 = arith.constant 0 : index
    %c0_57 = arith.constant 0 : index
    %85 = vector.load %arg19[%c0_56, %c0_57] : memref<1x256xf32, #tpu.memory_space<vmem>>, vector<1x256xf32>
    %86 = vector.broadcast %85 : vector<1x256xf32> to vector<16x256xf32>
    %87 = arith.addf %84, %86 : vector<16x256xf32>
    %88 = arith.negf %87 : vector<16x256xf32>
    %89 = math.exp %88 : vector<16x256xf32>
    %cst_58 = arith.constant 1.000000e+00 : f32
    %90 = vector.broadcast %cst_58 : f32 to vector<16x256xf32>
    %91 = arith.addf %90, %89 : vector<16x256xf32>
    %92 = arith.divf %90, %91 : vector<16x256xf32>
    %93 = arith.mulf %87, %92 : vector<16x256xf32>
    %c0_59 = arith.constant 0 : index
    %c0_60 = arith.constant 0 : index
    %94 = vector.load %arg20[%c0_59, %c0_60] : memref<256x128xbf16, #tpu.memory_space<vmem>>, vector<256x128xbf16>
    %95 = arith.truncf %93 : vector<16x256xf32> to vector<16x256xbf16>
    %cst_61 = arith.constant dense<0.000000e+00> : vector<16x128xf32>
    %96 = tpu.matmul %95, %94, %cst_61 {dimension_numbers = #tpu.dot_dimension_numbers<[1], [0], [0], [1], [0, 0, 1, 1], [], []>} : vector<16x256xbf16>, vector<256x128xbf16>, vector<16x128xf32> -> vector<16x128xf32>
    %c0_62 = arith.constant 0 : index
    %c0_63 = arith.constant 0 : index
    %97 = vector.load %arg21[%c0_62, %c0_63] : memref<1x128xf32, #tpu.memory_space<vmem>>, vector<1x128xf32>
    %98 = vector.broadcast %97 : vector<1x128xf32> to vector<16x128xf32>
    %99 = arith.addf %96, %98 : vector<16x128xf32>
    %100 = arith.negf %99 : vector<16x128xf32>
    %101 = math.exp %100 : vector<16x128xf32>
    %cst_64 = arith.constant 1.000000e+00 : f32
    %102 = vector.broadcast %cst_64 : f32 to vector<16x128xf32>
    %103 = arith.addf %102, %101 : vector<16x128xf32>
    %104 = arith.divf %102, %103 : vector<16x128xf32>
    %105 = arith.mulf %99, %104 : vector<16x128xf32>
    %c0_65 = arith.constant 0 : index
    %c0_66 = arith.constant 0 : index
    %106 = vector.load %arg22[%c0_65, %c0_66] : memref<128x128xbf16, #tpu.memory_space<vmem>>, vector<128x128xbf16>
    %107 = arith.truncf %105 : vector<16x128xf32> to vector<16x128xbf16>
    %cst_67 = arith.constant dense<0.000000e+00> : vector<16x128xf32>
    %108 = tpu.matmul %107, %106, %cst_67 {dimension_numbers = #tpu.dot_dimension_numbers<[1], [0], [0], [1], [0, 0, 1, 1], [], []>} : vector<16x128xbf16>, vector<128x128xbf16>, vector<16x128xf32> -> vector<16x128xf32>
    %c0_68 = arith.constant 0 : index
    %c0_69 = arith.constant 0 : index
    %109 = vector.load %arg23[%c0_68, %c0_69] : memref<1x128xf32, #tpu.memory_space<vmem>>, vector<1x128xf32>
    %110 = vector.broadcast %109 : vector<1x128xf32> to vector<16x128xf32>
    %111 = arith.addf %108, %110 : vector<16x128xf32>
    %c0_70 = arith.constant 0 : index
    %c0_71 = arith.constant 0 : index
    %112 = vector.load %arg24[%c0_70, %c0_71] : memref<128x128xbf16, #tpu.memory_space<vmem>>, vector<128x128xbf16>
    %113 = arith.truncf %111 : vector<16x128xf32> to vector<16x128xbf16>
    %cst_72 = arith.constant dense<0.000000e+00> : vector<16x128xf32>
    %114 = tpu.matmul %113, %112, %cst_72 {dimension_numbers = #tpu.dot_dimension_numbers<[1], [0], [0], [1], [0, 0, 1, 1], [], []>} : vector<16x128xbf16>, vector<128x128xbf16>, vector<16x128xf32> -> vector<16x128xf32>
    %c0_73 = arith.constant 0 : index
    %c0_74 = arith.constant 0 : index
    %115 = vector.load %arg25[%c0_73, %c0_74] : memref<1x128xf32, #tpu.memory_space<vmem>>, vector<1x128xf32>
    %116 = vector.broadcast %115 : vector<1x128xf32> to vector<16x128xf32>
    %117 = arith.addf %114, %116 : vector<16x128xf32>
    %cst_75 = arith.constant 0.000000e+00 : f32
    %118 = vector.broadcast %cst_75 : f32 to vector<16x128xf32>
    %119 = arith.maximumf %117, %118 : vector<16x128xf32>
    %c0_76 = arith.constant 0 : index
    %c0_77 = arith.constant 0 : index
    %120 = vector.load %arg26[%c0_76, %c0_77] : memref<128x128xbf16, #tpu.memory_space<vmem>>, vector<128x128xbf16>
    %121 = arith.truncf %119 : vector<16x128xf32> to vector<16x128xbf16>
    %cst_78 = arith.constant dense<0.000000e+00> : vector<16x128xf32>
    %122 = tpu.matmul %121, %120, %cst_78 {dimension_numbers = #tpu.dot_dimension_numbers<[1], [0], [0], [1], [0, 0, 1, 1], [], []>} : vector<16x128xbf16>, vector<128x128xbf16>, vector<16x128xf32> -> vector<16x128xf32>
    %c0_79 = arith.constant 0 : index
    %c0_80 = arith.constant 0 : index
    %123 = vector.load %arg27[%c0_79, %c0_80] : memref<1x128xf32, #tpu.memory_space<vmem>>, vector<1x128xf32>
    %124 = vector.broadcast %123 : vector<1x128xf32> to vector<16x128xf32>
    %125 = arith.addf %122, %124 : vector<16x128xf32>
    %cst_81 = arith.constant 0.000000e+00 : f32
    %126 = vector.broadcast %cst_81 : f32 to vector<16x128xf32>
    %127 = arith.maximumf %125, %126 : vector<16x128xf32>
    %c0_82 = arith.constant 0 : index
    %c0_83 = arith.constant 0 : index
    %128 = vector.load %arg28[%c0_82, %c0_83] : memref<128x128xbf16, #tpu.memory_space<vmem>>, vector<128x128xbf16>
    %129 = arith.truncf %127 : vector<16x128xf32> to vector<16x128xbf16>
    %cst_84 = arith.constant dense<0.000000e+00> : vector<16x128xf32>
    %130 = tpu.matmul %129, %128, %cst_84 {dimension_numbers = #tpu.dot_dimension_numbers<[1], [0], [0], [1], [0, 0, 1, 1], [], []>} : vector<16x128xbf16>, vector<128x128xbf16>, vector<16x128xf32> -> vector<16x128xf32>
    %c0_85 = arith.constant 0 : index
    %c0_86 = arith.constant 0 : index
    %131 = vector.load %arg29[%c0_85, %c0_86] : memref<1x128xf32, #tpu.memory_space<vmem>>, vector<1x128xf32>
    %132 = vector.broadcast %131 : vector<1x128xf32> to vector<16x128xf32>
    %133 = arith.addf %130, %132 : vector<16x128xf32>
    %c0_87 = arith.constant 0 : index
    %c0_88 = arith.constant 0 : index
    %134 = vector.load %arg30[%c0_87, %c0_88] : memref<16x128xf32, #tpu.memory_space<vmem>>, vector<16x128xf32>
    tpu.vector_store %arg30[%c0_87, %c0_88], %133 {strides = array<i32>} : memref<16x128xf32, #tpu.memory_space<vmem>>, vector<16x128xf32>,
    return
  }
}

</mosaic_0001>

<bundles_post_ra>
// kernel: tpu_custom_call.1
= control target key start
LH: loop header
LB: loop body
LE: loop exit
PB: predicated region body
PF: predicated region fallthrough
CT: control target
= control target key end

     0   :  { %7 = vsyncpa [#allocation4], 0  ;;  %v11_v0 = vlaneseq  ;;  %s320_s0 = inlined_call_operand.<no memory space> [shape: s32[1], index: 0, kind: input, shape index: {}]   ;;  %s321_s1 = inlined_call_operand.hbm [shape: f32[8,128], index: 1, kind: output, shape index: {}]  }
   0x1   :  { %v274_v1 = vstv %s320_s0  ;;  %s260_s0 = smov [#allocation3]  }
   0x2   :  { %v15_v2 = vadd.s32 %v274_v1, %v11_v0  ;;  %v13_v17 = vxor.u32 %v274_v1, %v274_v1  ;;  %s202_s8 = sshll.u32 %s260_s0, 4  ;;  %s203_s8 = int_to_ptr.vmem [resolvable:$true] %s202_s8 }
   0x3   :  { %s227_s9 = scalar_lea.vmem %s203_s8, 128  ;;  %p232_p1 = scmp.lt.s32.totalorder %s203_s8, %s203_s8 }
   0x4   :  { %v16_v3 = vadd.s32 %v15_v2, %v15_v2  ;;  %v17_v4 = vshll.u32 %v15_v2, 13  ;;  %v18_v5 = vshrl.u32 %v15_v2, 19  ;;  %v279_v22 = vxor.u32 466688986, %v13_v17  ;;  %p228_p0 = scmp.ne.s32.totalorder %s203_s8, %s227_s9  ;;  %p233_p2 = scmp.lt.s32.totalorder %s227_s9, %s227_s9 }
   0x6   :  { %v19_v6 = vor.u32 %v18_v5, %v17_v4  ;;  %p234_p3 = por %p233_p2, %p232_p1 }
   0x8   :  { %v20_v7 = vxor.u32 %v19_v6, %v16_v3  ;;  %p235_p4 = pnand %p234_p3, %p228_p0 }
   0xa   :  { %v21_v8 = vadd.s32 %v20_v7, %v16_v3  ;;  %v22_v9 = vshll.u32 %v20_v7, 15  ;;  %v23_v10 = vshrl.u32 %v20_v7, 17 }
   0xc   :  { %v24_v11 = vor.u32 %v23_v10, %v22_v9 }
   0xe   :  { %v25_v12 = vxor.u32 %v24_v11, %v21_v8 }
  0x10   :  { %v26_v13 = vadd.s32 %v25_v12, %v21_v8  ;;  %v27_v14 = vshll.u32 %v25_v12, 26  ;;  %v28_v15 = vshrl.u32 %v25_v12, 6 }
  0x12   :  { %v29_v16 = vor.u32 %v28_v15, %v27_v14 }
  0x14   :  { %v30_v18 = vxor.u32 %v29_v16, %v26_v13 }
  0x16   :  { %v31_v19 = vadd.s32 %v30_v18, %v26_v13  ;;  %v32_v20 = vshll.u32 %v30_v18, 6  ;;  %v33_v21 = vshrl.u32 %v30_v18, 26 }
  0x18   :  { %v34_v23 = vor.u32 %v33_v21, %v32_v20  ;;  %v36_v25 = vadd.s32 %v31_v19, %v274_v1 }
  0x1a   :  { %v35_v24 = vxor.u32 %v34_v23, %v31_v19 }
  0x1c   :  { %v37_v26 = vadd.s32 %v35_v24, %v279_v22 }
  0x1e   :  { %v38_v27 = vadd.s32 1, %v37_v26 }
  0x20   :  { %v39_v28 = vadd.s32 %v38_v27, %v36_v25  ;;  %v40_v29 = vshll.u32 %v38_v27, 17  ;;  %v41_v30 = vshrl.u32 %v38_v27, 15 }
  0x22   :  { %v42_v31 = vor.u32 %v41_v30, %v40_v29 }
  0x24   :  { %v43_v32 = vxor.u32 %v42_v31, %v39_v28 }
  0x26   :  { %v44_v33 = vadd.s32 %v43_v32, %v39_v28  ;;  %v45_v34 = vshll.u32 %v43_v32, 29  ;;  %v46_v35 = vshrl.u32 %v43_v32, 3 }
  0x28   :  { %v47_v36 = vor.u32 %v46_v35, %v45_v34 }
  0x2a   :  { %v48_v37 = vxor.u32 %v47_v36, %v44_v33 }
  0x2c   :  { %v49_v38 = vadd.s32 %v48_v37, %v44_v33  ;;  %v50_v39 = vshll.u32 %v48_v37, 16  ;;  %v51_v40 = vshrl.u32 %v48_v37, 16 }
  0x2e   :  { %v52_v41 = vor.u32 %v51_v40, %v50_v39 }
  0x30   :  { %v53_v42 = vxor.u32 %v52_v41, %v49_v38 }
  0x32   :  { %v54_v43 = vadd.s32 %v53_v42, %v49_v38  ;;  %v55_v44 = vshll.u32 %v53_v42, 24  ;;  %v56_v45 = vshrl.u32 %v53_v42, 8 }
  0x34   :  { %v57_v46 = vor.u32 %v56_v45, %v55_v44  ;;  %v59_v48 = vadd.s32 %v54_v43, %v279_v22 }
  0x36   :  { %v58_v47 = vxor.u32 %v57_v46, %v54_v43 }
  0x38   :  { %v60_v49 = vadd.s32 %v58_v47, %v274_v1 }
  0x3a   :  { %v61_v50 = vadd.s32 2, %v60_v49 }
  0x3c   :  { %v62_v51 = vadd.s32 %v61_v50, %v59_v48  ;;  %v63_v52 = vshll.u32 %v61_v50, 13  ;;  %v64_v53 = vshrl.u32 %v61_v50, 19 }
  0x3e   :  { %v65_v54 = vor.u32 %v64_v53, %v63_v52 }
  0x40   :  { %v66_v55 = vxor.u32 %v65_v54, %v62_v51 }
  0x42   :  { %v67_v56 = vadd.s32 %v66_v55, %v62_v51  ;;  %v68_v57 = vshll.u32 %v66_v55, 15  ;;  %v69_v58 = vshrl.u32 %v66_v55, 17 }
  0x44   :  { %v70_v59 = vor.u32 %v69_v58, %v68_v57 }
  0x46   :  { %v71_v60 = vxor.u32 %v70_v59, %v67_v56 }
  0x48   :  { %v72_v61 = vadd.s32 %v71_v60, %v67_v56  ;;  %v73_v62 = vshll.u32 %v71_v60, 26  ;;  %v74_v63 = vshrl.u32 %v71_v60, 6 }
  0x4a   :  { %v75_v0 = vor.u32 %v74_v63, %v73_v62 }
  0x4c   :  { %v76_v2 = vxor.u32 %v75_v0, %v72_v61 }
  0x4e   :  { %v77_v3 = vadd.s32 %v76_v2, %v72_v61  ;;  %v78_v4 = vshll.u32 %v76_v2, 6  ;;  %v79_v5 = vshrl.u32 %v76_v2, 26 }
  0x50   :  { %v80_v6 = vor.u32 %v79_v5, %v78_v4  ;;  %v82_v8 = vadd.s32 %v77_v3, %v274_v1 }
  0x52   :  { %v81_v7 = vxor.u32 %v80_v6, %v77_v3 }
  0x54   :  { %v83_v9 = vadd.s32 %v81_v7, %v274_v1 }
  0x56   :  { %v84_v10 = vadd.s32 3, %v83_v9 }
  0x58   :  { %v85_v11 = vadd.s32 %v84_v10, %v82_v8  ;;  %v86_v12 = vshll.u32 %v84_v10, 17  ;;  %v87_v13 = vshrl.u32 %v84_v10, 15 }
  0x5a   :  { %v88_v14 = vor.u32 %v87_v13, %v86_v12 }
  0x5c   :  { %v89_v15 = vxor.u32 %v88_v14, %v85_v11 }
  0x5e   :  { %v90_v16 = vadd.s32 %v89_v15, %v85_v11  ;;  %v91_v17 = vshll.u32 %v89_v15, 29  ;;  %v92_v18 = vshrl.u32 %v89_v15, 3 }
  0x60   :  { %v93_v19 = vor.u32 %v92_v18, %v91_v17 }
  0x62   :  { %v94_v20 = vxor.u32 %v93_v19, %v90_v16 }
  0x64   :  { %v95_v21 = vadd.s32 %v94_v20, %v90_v16  ;;  %v96_v23 = vshll.u32 %v94_v20, 16  ;;  %v97_v24 = vshrl.u32 %v94_v20, 16  ;;  %v251_v20 = vmov -0.00020021426  }
  0x66   :  { %v98_v25 = vor.u32 %v97_v24, %v96_v23  ;;  %v252_v24 = vmov 0.00010095056  }
  0x68   :  { %v99_v26 = vxor.u32 %v98_v25, %v95_v21 }
  0x6a   :  { %v100_v27 = vadd.s32 %v99_v26, %v95_v21  ;;  %v101_v28 = vshll.u32 %v99_v26, 24  ;;  %v102_v29 = vshrl.u32 %v99_v26, 8 }
  0x6c   :  { %v103_v30 = vor.u32 %v102_v29, %v101_v28  ;;  %v105_v32 = vadd.s32 %v100_v27, %v274_v1  ;;  %v253_v28 = vmov 0.0013493432  }
  0x6e   :  { %v104_v31 = vxor.u32 %v103_v30, %v100_v27 }
  0x70   :  { %v106_v33 = vadd.s32 %v104_v31, %v279_v22 }
  0x72   :  { %v107_v34 = vadd.s32 4, %v106_v33 }
  0x74   :  { %v108_v35 = vadd.s32 %v107_v34, %v105_v32  ;;  %v109_v36 = vshll.u32 %v107_v34, 13  ;;  %v110_v37 = vshrl.u32 %v107_v34, 19  ;;  %v254_v32 = vmov -0.0036734284  }
  0x76   :  { %v111_v38 = vor.u32 %v110_v37, %v109_v36  ;;  %v255_v36 = vmov 0.0057395077  }
  0x78   :  { %v112_v39 = vxor.u32 %v111_v38, %v108_v35 }
  0x7a   :  { %v113_v40 = vadd.s32 %v112_v39, %v108_v35  ;;  %v114_v41 = vshll.u32 %v112_v39, 15  ;;  %v115_v42 = vshrl.u32 %v112_v39, 17 }
  0x7c   :  { %v116_v43 = vor.u32 %v115_v42, %v114_v41 }
  0x7e   :  { %v117_v44 = vxor.u32 %v116_v43, %v113_v40 }
  0x80   :  { %v118_v45 = vadd.s32 %v117_v44, %v113_v40  ;;  %v119_v46 = vshll.u32 %v117_v44, 26  ;;  %v120_v47 = vshrl.u32 %v117_v44, 6  ;;  %v256_v40 = vmov -0.0076224613  }
  0x81   :  { %v257_v44 = vmov 0.0094388705  }
  0x82   :  { %v121_v48 = vor.u32 %v120_v47, %v119_v46 }
  0x84   :  { %v122_v49 = vxor.u32 %v121_v48, %v118_v45  ;;  %v258_v48 = vmov 1.001674  }
  0x86   :  { %v123_v50 = vadd.s32 %v122_v49, %v118_v45  ;;  %v124_v51 = vshll.u32 %v122_v49, 6  ;;  %v125_v52 = vshrl.u32 %v122_v49, 26 }
  0x88   :  { %v126_v53 = vor.u32 %v125_v52, %v124_v51  ;;  %v128_v55 = vadd.s32 %v123_v50, %v279_v22  ;;  %v259_v52 = vmov 2.8329768  }
  0x8a   :  { %v127_v54 = vxor.u32 %v126_v53, %v123_v50 }
  0x8c   :  { %v129_v56 = vadd.s32 %v127_v54, %v274_v1 }
  0x8e   :  { %v130_v57 = vadd.s32 5, %v129_v56 }
  0x90   :  { %v131_v58 = vxor.u32 %v130_v57, %v128_v55 }
  0x92   :  { %132 = set.rngseed %v131_v58 }
  0x93   :  { %v133_v59 = vrng }
  0x94   :  { %v134_v60 = vshrl.u32 %v133_v59, 9 }
  0x96   :  { %v135_v61 = vor.u32 1065353216, %v134_v60 }
  0x98   :  { %v210_v62 = vadd.f32 -1.0, %v135_v61 }
  0x9a   :  { %v138_v63 = vmul.f32 2.0, %v210_v62 }
  0x9c   :  { %v139_v0 = vadd.f32 -0.99999994, %v138_v63 }
  0x9e   :  { %v291_v2 = vmax.f32 %v139_v0, -0.99999994 }
  0xa0   :  { %v141_v3 = vsub.f32 0.0, %v291_v2  ;;  %v189_v54 = vand.u32 2147483647, %v291_v2  ;;  %v191_v56 = vmul.f32 inf, %v291_v2 }
  0xa2   :  { %v142_v4 = vmul.f32 %v141_v3, %v291_v2  ;;  %vm190_vm4 = vcmp.eq.f32.partialorder %v189_v54, 1.0 }
  0xa4   :  { %v143_v5 = vadd.f32 1.0, %v142_v4  ;;  %v146_v22 = vmul.f32 -0.5, %v142_v4  ;;  %v149_v1 = vand.u32 2147483647, %v142_v4 }
  0xa6   :  { %223 = vlog2.f32 %v143_v5  ;;  %v147_v6 = vadd.f32 1.0, %v146_v22  ;;  %vm150_vm0 = vcmp.lt.f32.partialorder %v149_v1, 0.0004427343 }
  0xa8   :  { %v148_v9 = vmul.f32 %v147_v6, %v142_v4 }
  0xb0   :  { %v224_v7 = vpop.eup %223 }
  0xb1   :  { %v145_v8 = vmul.f32 0.6931472, %v224_v7 }
  0xb3   :  { %v151_v10 = vsel %vm150_vm0, %v148_v9, %v145_v8 }
  0xb4   :  { %v152_v11 = vsub.f32 0.0, %v151_v10 }
  0xb6   :  { %225 = vrsqrt.f32 %v152_v11  ;;  %vm157_vm1 = vcmp.eq.f32.partialorder %v152_v11, inf  ;;  %v160_v14 = vand.u32 2147483648, %v152_v11  ;;  %vm159_vm2 = vcmp.eq.f32.partialorder %v152_v11, 0.0 }
  0xb7   :  { %vm153_vm3 = vcmp.lt.f32.partialorder %v152_v11, 5.0  ;;  %v211_v17 = vadd.f32 -2.5, %v152_v11 }
  0xb8   :  { %v164_v21 = vsel %vm153_vm3, 2.8102264e-08, %v251_v20  ;;  %v165_v25 = vsel %vm153_vm3, 3.4327394e-07, %v252_v24  ;;  %v168_v29 = vsel %vm153_vm3, -3.5233877e-06, %v253_v28 }
  0xb9   :  { %v171_v33 = vsel %vm153_vm3, -4.3915065e-06, %v254_v32  ;;  %v174_v37 = vsel %vm153_vm3, 0.00021858087, %v255_v36  ;;  %v177_v41 = vsel %vm153_vm3, -0.001253725, %v256_v40 }
  0xba   :  { %v180_v45 = vsel %vm153_vm3, -0.0041776816, %v257_v44  ;;  %v183_v49 = vsel %vm153_vm3, 0.24664073, %v258_v48  ;;  %v186_v53 = vsel %vm153_vm3, 1.5014094, %v259_v52 }
  0xc0   :  { %v226_v12 = vpop.eup %225 }
  0xc1   :  { %v156_v13 = vmul.f32 %v226_v12, %v152_v11 }
  0xc3   :  { %v158_v15 = vsel %vm157_vm1, %v152_v11, %v156_v13 }
  0xc4   :  { %v161_v16 = vsel %vm159_vm2, %v160_v14, %v158_v15 }
  0xc5   :  { %v212_v18 = vadd.f32 -3.0, %v161_v16 }
  0xc7   :  { %v163_v19 = vsel %vm153_vm3, %v211_v17, %v212_v18 }
  0xc8   :  { %v166_v23 = vmul.f32 %v164_v21, %v163_v19 }
  0xca   :  { %v167_v26 = vadd.f32 %v166_v23, %v165_v25 }
  0xcc   :  { %v169_v27 = vmul.f32 %v167_v26, %v163_v19 }
  0xce   :  { %v170_v30 = vadd.f32 %v169_v27, %v168_v29 }
  0xd0   :  { %v172_v31 = vmul.f32 %v170_v30, %v163_v19 }
  0xd2   :  { %v173_v34 = vadd.f32 %v172_v31, %v171_v33 }
  0xd4   :  { %v175_v35 = vmul.f32 %v173_v34, %v163_v19 }
  0xd6   :  { %v176_v38 = vadd.f32 %v175_v35, %v174_v37 }
  0xd8   :  { %v178_v39 = vmul.f32 %v176_v38, %v163_v19 }
  0xda   :  { %v179_v42 = vadd.f32 %v178_v39, %v177_v41 }
  0xdc   :  { %v181_v43 = vmul.f32 %v179_v42, %v163_v19 }
  0xde   :  { %v182_v46 = vadd.f32 %v181_v43, %v180_v45 }
  0xe0   :  { %v184_v47 = vmul.f32 %v182_v46, %v163_v19 }
  0xe2   :  { %v185_v50 = vadd.f32 %v184_v47, %v183_v49 }
  0xe4   :  { %v187_v51 = vmul.f32 %v185_v50, %v163_v19 }
  0xe6   :  { %v188_v55 = vadd.f32 %v187_v51, %v186_v53 }
  0xe8   :  { %v192_v57 = vmul.f32 %v188_v55, %v291_v2 }
  0xea   :  { %v193_v58 = vsel %vm190_vm4, %v191_v56, %v192_v57 }
  0xeb   :  { %v194_v59 = vmul.f32 1.4142135, %v193_v58 }
  0xed   :  { %195 = vst [vmem:[#allocation3] sm:$0xff] %v194_v59 }
  0xee   :  { %238 = shalt.err (!%p235_p4)
}
  0xef   :  { %s239_s12 = scalar_lea.hbm %s321_s1, 128 }
  0xf0   :  { %p240_p5 = scmp.ne.s32.totalorder %s321_s1, %s239_s12  ;;  %p243_p6 = scmp.lt.u32.totalorder %s239_s12, %s321_s1 }
  0xf2   :  { %p245_p7 = pnand %p243_p6, %p240_p5 }
  0xf4   :  { %248 = shalt.err (!%p245_p7)
}
  0xf5   :  { %205 = dma.vmem_to_hbm [thread:$0]  %s203_s8, 128, %s321_s1, [#allocation4]  }
  0xf6   :  { %249 = dma.done.wait [#allocation4], 128  }
  0xf7   :  { %250 = vsyncadd [#allocation4], 4294967168 }
  0xf8   :  { %209 = vsyncpa [#allocation4], 1 }

// kernel: vae_forward.1
= control target key start
LH: loop header
LB: loop body
LE: loop exit
PB: predicated region body
PF: predicated region fallthrough
CT: control target
= control target key end

     0   :  { %s4423_s3 = smov 2   ;;  %s4424_s7 = smov 1   ;;  %v4425_v0 = vmov 0.0   ;;  %vm149_vm0 = vcmask 523264   ;;  %vm4427_vm1 = vmmov 0   ;;  %v4430_v63 = vmov 0   ;;  %s4950_s0 = inlined_call_operand.smem [shape: u32[33], index: -1, kind: input, shape index: {}] }
   0x1   :  { %s3157_s6 = sld [smem:[%s4950_s0 + %s4423_s3]]   ;;  %3646 = vmatprep.subr.bf16.mxu1 %v4425_v0  ;;  %s4426_s11 = smov 4   ;;  %3662 = vmatprep.mubr.msk.bf16.mxu1 %vm4427_vm1, %v4425_v0 }
   0x2   :  { %s4469_s10 = sld [smem:[%s4950_s0 + %s4424_s7]]   ;;  %s4428_s15 = smov 6  }
   0x3   :  { %s4475_s14 = sld [smem:[%s4950_s0 + %s4426_s11]]   ;;  %s4429_s19 = smov 3  }
   0x4   :  { %s4501_s18 = sld [smem:[%s4950_s0 + %s4428_s15]]   ;;  %s4431_s23 = smov 8  }
   0x5   :  { %s3158_s22 = sld [smem:[%s4950_s0 + %s4429_s19]]   ;;  %s4432_s27 = smov 5  }
   0x6   :  { %s4543_s26 = sld [smem:[%s4950_s0 + %s4431_s23]]   ;;  %s4433_s1 = smov 7  }
   0x7   :  { %v134_v1 = vld [vmem:[%s3157_s6] sm:$0xff]  ;;  %v135_v2 = vld [vmem:[%s3157_s6 + $0x8] sm:$0xff]  ;;  %v136_v3 = vld [vmem:[%s3157_s6 + $0x10] sm:$0xff]  ;;  %s3160_s30 = sld [smem:[%s4950_s0 + %s4432_s27]]   ;;  %s4434_s5 = smov 10  }
   0x8   :  { %v3816_v4 = vpack.c.bf16 %v135_v2, %v134_v1  ;;  %v137_v5 = vld [vmem:[%s3157_s6 + $0x18] sm:$0xff]  ;;  %v138_v7 = vld [vmem:[%s3157_s6 + $0x20] sm:$0xff]  ;;  %v139_v8 = vld [vmem:[%s3157_s6 + $0x28] sm:$0xff]  ;;  %s3162_s4 = sld [smem:[%s4950_s0 + %s4433_s1]]   ;;  %s4435_s9 = smov 9  }
   0x9   :  { %v3820_v6 = vpack.c.bf16 %v137_v5, %v136_v3  ;;  %v132_v9 = vld [vmem:[%s4469_s10] sm:$0xff]  ;;  %v140_v10 = vld [vmem:[%s3157_s6 + $0x30] sm:$0xff]  ;;  %v3824_v12 = vpack.c.bf16 %v139_v8, %v138_v7  ;;  %v141_v13 = vld [vmem:[%s3157_s6 + $0x38] sm:$0xff]  ;;  %s3165_s8 = sld [smem:[%s4950_s0 + %s4434_s5]]   ;;  %s4436_s13 = smov 12  }
   0xa   :  { %3817 = vmatprep.subr.bf16.mxu0 %v3816_v4  ;;  %3643 = vmatprep.mubr.msk.f32.mxu0 %vm149_vm0, %v132_v9  ;;  %v3947_v11 = vld [vmem:[%s4475_s14] sm:$0xff]   ;;  %v3948_v14 = vld [vmem:[%s4475_s14 + $0x8] sm:$0xff]   ;;  %v3828_v15 = vpack.c.bf16 %v141_v13, %v140_v10  ;;  %v3949_v16 = vld [vmem:[%s4475_s14 + $0x10] sm:$0xff]   ;;  %s3164_s12 = sld [smem:[%s4950_s0 + %s4435_s9]]   ;;  %s4437_s17 = smov 14  }
   0xb   :  { %3819 = vmatpush3.bf16.msra.mxu0 %v3816_v4  ;;  %3647 = vmatpush3.bf16.msra.mxu1 %v3947_v11  ;;  %v3950_v17 = vld [vmem:[%s4475_s14 + $0x18] sm:$0xff]   ;;  %v133_v18 = vld [vmem:[%s4469_s10 + $0x8] sm:$0xff]  ;;  %v3951_v19 = vld [vmem:[%s4475_s14 + $0x20] sm:$0xff]   ;;  %s4656_s16 = sld [smem:[%s4950_s0 + %s4436_s13]]   ;;  %s4438_s21 = smov 11  }
   0xc   :  { %3821 = vmatprep.subr.bf16.mxu0 %v3820_v6  ;;  %3648 = vmatprep.subr.bf16.mxu1 %v4425_v0  ;;  %v3952_v20 = vld [vmem:[%s4475_s14 + $0x28] sm:$0xff]   ;;  %v3953_v21 = vld [vmem:[%s4475_s14 + $0x30] sm:$0xff]   ;;  %v3954_v22 = vld [vmem:[%s4475_s14 + $0x38] sm:$0xff]   ;;  %s4675_s20 = sld [smem:[%s4950_s0 + %s4437_s17]]   ;;  %s4439_s25 = smov 16  }
   0xd   :  { %v3955_v23 = vld [vmem:[%s4501_s18] ss:$16 sps:$4 sm:$0xff]   ;;  %v3957_v24 = vld [vmem:[%s4501_s18 + $0x4] ss:$16 sps:$4 sm:$0xff]   ;;  %v3960_v25 = vld [vmem:[%s4501_s18 + $0xc] ss:$16 sps:$4 sm:$0xff]   ;;  %s3166_s24 = sld [smem:[%s4950_s0 + %s4438_s21]]  }
   0xe   :  { %v3963_v26 = vld [vmem:[%s4501_s18 + $0x24] ss:$16 sps:$4 sm:$0xff]   ;;  %v3961_v27 = vld [vmem:[%s4501_s18 + $0x20] ss:$16 sps:$4 sm:$0xff]   ;;  %v3958_v43 = vld [vmem:[%s4501_s18 + $0x8] ss:$16 sps:$4 sm:$0xff]   ;;  %s4702_s28 = sld [smem:[%s4950_s0 + %s4439_s25]]  }
   0xf   :  { %3823 = vmatpush3.bf16.msra.mxu0 %v3820_v6  ;;  %3649 = vmatpush3.bf16.msra.mxu1 %v3948_v14  ;;  %v3969_v28 = vld [vmem:[%s4501_s18 + $0x44] ss:$16 sps:$4 sm:$0xff]   ;;  %v3967_v29 = vld [vmem:[%s4501_s18 + $0x40] ss:$16 sps:$4 sm:$0xff]   ;;  %v3966_v45 = vld [vmem:[%s4501_s18 + $0x2c] ss:$16 sps:$4 sm:$0xff]   ;;  %s1_s21 = sld [smem:[%s4950_s0]]  }
  0x10   :  { %3825 = vmatprep.subr.bf16.mxu0 %v3824_v12  ;;  %3650 = vmatprep.subr.bf16.mxu1 %v4425_v0  ;;  %v3975_v30 = vld [vmem:[%s4501_s18 + $0x64] ss:$16 sps:$4 sm:$0xff]   ;;  %v3973_v31 = vld [vmem:[%s4501_s18 + $0x60] ss:$16 sps:$4 sm:$0xff]   ;;  %v3964_v46 = vld [vmem:[%s4501_s18 + $0x28] ss:$16 sps:$4 sm:$0xff]  }
  0x11   :  { %v3981_v32 = vld [vmem:[%s4501_s18 + $0x84] ss:$16 sps:$4 sm:$0xff]   ;;  %v3979_v33 = vld [vmem:[%s4501_s18 + $0x80] ss:$16 sps:$4 sm:$0xff]   ;;  %v3972_v47 = vld [vmem:[%s4501_s18 + $0x4c] ss:$16 sps:$4 sm:$0xff]  }
  0x12   :  { %v3987_v34 = vld [vmem:[%s4501_s18 + $0xa4] ss:$16 sps:$4 sm:$0xff]   ;;  %v3985_v35 = vld [vmem:[%s4501_s18 + $0xa0] ss:$16 sps:$4 sm:$0xff]   ;;  %v3970_v48 = vld [vmem:[%s4501_s18 + $0x48] ss:$16 sps:$4 sm:$0xff]  }
  0x13   :  { %3827 = vmatpush3.bf16.msra.mxu0 %v3824_v12  ;;  %3651 = vmatpush3.bf16.msra.mxu1 %v3949_v16  ;;  %v3188_v36 = vld [vmem:[%s3158_s22] ss:$0 sm:$0xff]  ;;  %v3978_v49 = vld [vmem:[%s4501_s18 + $0x6c] ss:$16 sps:$4 sm:$0xff]   ;;  %v3976_v50 = vld [vmem:[%s4501_s18 + $0x68] ss:$16 sps:$4 sm:$0xff]  }
  0x14   :  { %3829 = vmatprep.subr.bf16.mxu0 %v3828_v15  ;;  %3652 = vmatprep.subr.bf16.mxu1 %v4425_v0  ;;  %v3984_v51 = vld [vmem:[%s4501_s18 + $0x8c] ss:$16 sps:$4 sm:$0xff]   ;;  %v3982_v52 = vld [vmem:[%s4501_s18 + $0x88] ss:$16 sps:$4 sm:$0xff]   ;;  %v3993_v55 = vld [vmem:[%s4501_s18 + $0xc4] ss:$16 sps:$4 sm:$0xff]  }
  0x15   :  { %v3990_v53 = vld [vmem:[%s4501_s18 + $0xac] ss:$16 sps:$4 sm:$0xff]   ;;  %v3988_v54 = vld [vmem:[%s4501_s18 + $0xa8] ss:$16 sps:$4 sm:$0xff]   ;;  %v3991_v57 = vld [vmem:[%s4501_s18 + $0xc0] ss:$16 sps:$4 sm:$0xff]  }
  0x16   :  { %v3996_v56 = vld [vmem:[%s4501_s18 + $0xcc] ss:$16 sps:$4 sm:$0xff]   ;;  %v3994_v58 = vld [vmem:[%s4501_s18 + $0xc8] ss:$16 sps:$4 sm:$0xff]   ;;  %v3999_v59 = vld [vmem:[%s4501_s18 + $0xe4] ss:$16 sps:$4 sm:$0xff]  }
  0x17   :  { %3831 = vmatpush3.bf16.msra.mxu0 %v3828_v15  ;;  %3653 = vmatpush3.bf16.msra.mxu1 %v3950_v17  ;;  %v4002_v60 = vld [vmem:[%s4501_s18 + $0xec] ss:$16 sps:$4 sm:$0xff]   ;;  %v3997_v61 = vld [vmem:[%s4501_s18 + $0xe0] ss:$16 sps:$4 sm:$0xff]   ;;  %v4000_v62 = vld [vmem:[%s4501_s18 + $0xe8] ss:$16 sps:$4 sm:$0xff]  }
  0x18   :  { %3654 = vmatprep.subr.bf16.mxu1 %v4425_v0  ;;  %563 = vmatprep.subr.bf16.mxu0 %v3957_v24  ;;  %v4005_v1 = vld [vmem:[%s4543_s26 + $0x4] ss:$8 sps:$4 sm:$0xff]   ;;  %v3191_v2 = vld [vmem:[%s3160_s30] ss:$0 sm:$0xff]  ;;  %v4008_v13 = vld [vmem:[%s4543_s26 + $0x14] ss:$8 sps:$4 sm:$0xff]  }
  0x19   :  { %v4003_v11 = vld [vmem:[%s4543_s26] ss:$8 sps:$4 sm:$0xff]   ;;  %v4006_v14 = vld [vmem:[%s4543_s26 + $0x10] ss:$8 sps:$4 sm:$0xff]   ;;  %v4011_v15 = vld [vmem:[%s4543_s26 + $0x24] ss:$8 sps:$4 sm:$0xff]  }
  0x1a   :  { %3644 = vmatmul.mubr.msk.f32.vlgmr.msra.gmra.mrb[0].mxu0 %vm149_vm0, %v133_v18  ;;  %v4009_v16 = vld [vmem:[%s4543_s26 + $0x20] ss:$8 sps:$4 sm:$0xff]   ;;  %v4014_v17 = vld [vmem:[%s4543_s26 + $0x34] ss:$8 sps:$4 sm:$0xff]   ;;  %v4012_v18 = vld [vmem:[%s4543_s26 + $0x30] ss:$8 sps:$4 sm:$0xff]  }
  0x1b   :  { %3655 = vmatpush3.bf16.msra.mxu1 %v3951_v19  ;;  %564 = vmatpush1.bf16.msra.mxu0 %v3955_v23  ;;  %v4017_v19 = vld [vmem:[%s4543_s26 + $0x44] ss:$8 sps:$4 sm:$0xff]   ;;  %v4021_v24 = vld [vmem:[%s4543_s26 + $0x60] ss:$8 sps:$4 sm:$0xff]   ;;  %s4440_s29 = smov 18   ;;  %s4441_s3 = smov 13  }
  0x1c   :  { %3656 = vmatprep.subr.bf16.mxu1 %v4425_v0  ;;  %565 = vmatprep.subr.bf16.mxu0 %v3963_v26  ;;  %v4023_v23 = vld [vmem:[%s4543_s26 + $0x64] ss:$8 sps:$4 sm:$0xff]   ;;  %v4024_v26 = vld [vmem:[%s4543_s26 + $0x70] ss:$8 sps:$4 sm:$0xff]   ;;  %s4739_s2 = sld [smem:[%s4950_s0 + %s4440_s29]]   ;;  %s4442_s7 = smov 31  }
  0x1d   :  { %595 = vmatprep.mubr.bf16.mxu0 %v4430_v63  ;;  %s3168_s6 = sld [smem:[%s4950_s0 + %s4441_s3]]   ;;  %s4443_s11 = smov 15  }
  0x1e   :  { %s3186_s10 = sld [smem:[%s4950_s0 + %s4442_s7]]   ;;  %s4444_s15 = smov 32  }
  0x1f   :  { %3657 = vmatpush3.bf16.msra.mxu1 %v3952_v20  ;;  %566 = vmatpush1.bf16.msra.mxu0 %v3961_v27  ;;  %v4015_v20 = vld [vmem:[%s4543_s26 + $0x40] ss:$8 sps:$4 sm:$0xff]   ;;  %v4029_v27 = vld [vmem:[%s4543_s26 + $0x84] ss:$8 sps:$4 sm:$0xff]   ;;  %s3170_s14 = sld [smem:[%s4950_s0 + %s4443_s11]]   ;;  %s4445_s22 = smov 17  }
  0x20   :  { %3658 = vmatprep.subr.bf16.mxu1 %v4425_v0  ;;  %567 = vmatprep.subr.bf16.mxu0 %v3969_v28  ;;  %v4027_v28 = vld [vmem:[%s4543_s26 + $0x80] ss:$8 sps:$4 sm:$0xff]   ;;  %s3187_s18 = sld [smem:[%s4950_s0 + %s4444_s15]]   ;;  %s4447_s30 = smov 19  }
  0x21   :  { %s3172_s25 = sld [smem:[%s4950_s0 + %s4445_s22]]  }
  0x22   :  { %s3174_s3 = sld [smem:[%s4950_s0 + %s4447_s30]]  }
  0x23   :  { %3659 = vmatpush3.bf16.msra.mxu1 %v3953_v21  ;;  %568 = vmatpush1.bf16.msra.mxu0 %v3967_v29  ;;  %v4020_v21 = vld [vmem:[%s4543_s26 + $0x54] ss:$8 sps:$4 sm:$0xff]  }
  0x24   :  { %3660 = vmatprep.subr.bf16.mxu1 %v4425_v0  ;;  %569 = vmatprep.subr.bf16.mxu0 %v3975_v30  ;;  %v4032_v29 = vld [vmem:[%s4543_s26 + $0x94] ss:$8 sps:$4 sm:$0xff]   ;;  %v4030_v30 = vld [vmem:[%s4543_s26 + $0x90] ss:$8 sps:$4 sm:$0xff]  }
  0x27   :  { %3661 = vmatpush3.bf16.msra.mxu1 %v3954_v22  ;;  %570 = vmatpush1.bf16.msra.mxu0 %v3973_v31  ;;  %v4018_v22 = vld [vmem:[%s4543_s26 + $0x50] ss:$8 sps:$4 sm:$0xff]   ;;  %v4035_v31 = vld [vmem:[%s4543_s26 + $0xa4] ss:$8 sps:$4 sm:$0xff]  }
  0x28   :  { %606 = vmatprep.subr.bf16.mxu1 %v3960_v25  ;;  %571 = vmatprep.subr.bf16.mxu0 %v3981_v32  ;;  %v4026_v25 = vld [vmem:[%s4543_s26 + $0x74] ss:$8 sps:$4 sm:$0xff]   ;;  %v4033_v32 = vld [vmem:[%s4543_s26 + $0xa0] ss:$8 sps:$4 sm:$0xff]  }
  0x2b   :  { %572 = vmatpush1.bf16.msra.mxu0 %v3979_v33  ;;  %v4038_v33 = vld [vmem:[%s4543_s26 + $0xb4] ss:$8 sps:$4 sm:$0xff]  }
  0x2c   :  { %573 = vmatprep.subr.bf16.mxu0 %v3987_v34  ;;  %v4036_v34 = vld [vmem:[%s4543_s26 + $0xb0] ss:$8 sps:$4 sm:$0xff]  }
  0x2f   :  { %574 = vmatpush1.bf16.msra.mxu0 %v3985_v35  ;;  %v4041_v35 = vld [vmem:[%s4543_s26 + $0xc4] ss:$8 sps:$4 sm:$0xff]  }
  0x30   :  { %575 = vmatprep.subr.bf16.mxu0 %v3993_v55 }
  0x33   :  { %576 = vmatpush1.bf16.msra.mxu0 %v3991_v57 }
  0x34   :  { %577 = vmatprep.subr.bf16.mxu0 %v3999_v59 }
  0x37   :  { %578 = vmatpush1.bf16.msra.mxu0 %v3997_v61 }
  0x38   :  { %1105 = vmatprep.subr.bf16.mxu0 %v4005_v1 }
  0xed   :  { %v3645_v37 = vpop.f32.mrb[0].mxu0 }
  0xee   :  { %v228_v38 = vadd.f32 %v3645_v37, %v3188_v36  ;;  %v222_v39 = vpop.f32.mrb[1].mxu0  ;;  %v4044_v37 = vld [vmem:[%s4543_s26 + $0xd4] ss:$8 sps:$4 sm:$0xff]  }
  0xef   :  { %v223_v40 = vadd.f32 %v3188_v36, %v222_v39  ;;  %v4039_v36 = vld [vmem:[%s4543_s26 + $0xc0] ss:$8 sps:$4 sm:$0xff]   ;;  %v4047_v39 = vld [vmem:[%s4543_s26 + $0xe4] ss:$8 sps:$4 sm:$0xff]  }
  0xf0   :  { %v232_v41 = vmax.f32 %v228_v38, 0.0  ;;  %v4042_v38 = vld [vmem:[%s4543_s26 + $0xd0] ss:$8 sps:$4 sm:$0xff]  }
  0xf1   :  { %v231_v42 = vmax.f32 %v223_v40, 0.0  ;;  %v4045_v40 = vld [vmem:[%s4543_s26 + $0xe0] ss:$8 sps:$4 sm:$0xff]  }
  0xf3   :  { %v249_v44 = vpack.c.bf16 %v232_v41, %v231_v42  ;;  %v4050_v41 = vld [vmem:[%s4543_s26 + $0xf4] ss:$8 sps:$4 sm:$0xff]   ;;  %v4048_v42 = vld [vmem:[%s4543_s26 + $0xf0] ss:$8 sps:$4 sm:$0xff]  }
  0xf5   :  { %3663 = vmatmul.mubr.bf16.vlgmr.msra.gmra.mrb[0].mxu1 %v249_v44  ;;  %v383_v44 = vlaneseq }
  0xf6   :  { %607 = vmatpush1.bf16.msra.mxu1 %v3958_v43  ;;  %638 = vmatprep.mubr.bf16.mxu1 %v4430_v63  ;;  %v4053_v43 = vld [vmem:[%s4543_s26 + $0x104] ss:$8 sps:$4 sm:$0xff]  }
  0xf7   :  { %608 = vmatprep.subr.bf16.mxu1 %v3966_v45  ;;  %v4584_v45 = vshrl.u32 %v383_v44, 7 }
  0xfa   :  { %609 = vmatpush1.bf16.msra.mxu1 %v3964_v46  ;;  %v4587_v46 = vsub.s32 0, %v4584_v45 }
  0xfb   :  { %610 = vmatprep.subr.bf16.mxu1 %v3972_v47  ;;  %v393_v47 = vsub.s32 2, %v4584_v45 }
  0xfe   :  { %611 = vmatpush1.bf16.msra.mxu1 %v3970_v48  ;;  %v381_v48 = vld [vmem:[%s3162_s4] sm:$0xf]  ;;  %s4448_s4 = smov 22  }
  0xff   :  { %612 = vmatprep.subr.bf16.mxu1 %v3978_v49  ;;  %v4591_v49 = vsub.s32 1, %v4584_v45  ;;  %s3177_s7 = sld [smem:[%s4950_s0 + %s4448_s4]]  }
 0x102   :  { %613 = vmatpush1.bf16.msra.mxu1 %v3976_v50  ;;  %v397_v50 = vsub.s32 3, %v4584_v45 }
 0x103   :  { %614 = vmatprep.subr.bf16.mxu1 %v3984_v51  ;;  %v386_v51 = vrot.slane %v381_v48, %v4587_v46 }
 0x106   :  { %615 = vmatpush1.bf16.msra.mxu1 %v3982_v52  ;;  %v394_v52 = vrot.slane %v381_v48, %v393_v47 }
 0x107   :  { %616 = vmatprep.subr.bf16.mxu1 %v3990_v53  ;;  %v390_v53 = vrot.slane %v381_v48, %v4591_v49 }
 0x10a   :  { %617 = vmatpush1.bf16.msra.mxu1 %v3988_v54  ;;  %v398_v54 = vrot.slane %v381_v48, %v397_v50 }
 0x10b   :  { %618 = vmatprep.subr.bf16.mxu1 %v3996_v56 }
 0x10e   :  { %619 = vmatpush1.bf16.msra.mxu1 %v3994_v58 }
 0x10f   :  { %620 = vmatprep.subr.bf16.mxu1 %v4002_v60 }
 0x112   :  { %621 = vmatpush1.bf16.msra.mxu1 %v4000_v62 }
 0x1c8   :  { %v339_v3 = vpop.f32.mrb[0].mxu1 }
 0x1c9   :  { %v340_v4 = vadd.f32 %v3191_v2, %v339_v3  ;;  %v3664_v5 = vpop.f32.mrb[1].mxu1 }
 0x1ca   :  { %v342_v6 = vpop.f32.mrb[2].mxu1 }
 0x1cb   :  { %v343_v7 = vadd.f32 %v3191_v2, %v342_v6  ;;  %v3665_v8 = vpop.f32.mrb[3].mxu1  ;;  %v346_v9 = vmax.f32 %v340_v4, 0.0 }
 0x1cd   :  { %v347_v10 = vmax.f32 %v343_v7, 0.0 }
 0x1cf   :  { %v380_v12 = vpack.c.bf16 %v347_v10, %v346_v9 }
 0x1d1   :  { %596 = vmatmul.mubr.bf16.vlgmr.msra.gmra.mrb[4].mxu0 %v380_v12  ;;  %639 = vmatmul.mubr.bf16.vlgmr.msra.gmra.mrb[4].mxu1 %v380_v12 }
 0x1d2   :  { %1106 = vmatpush1.bf16.msra.mxu0 %v4003_v11 }
 0x1d3   :  { %1107 = vmatprep.subr.bf16.mxu0 %v4008_v13 }
 0x1d6   :  { %1108 = vmatpush1.bf16.msra.mxu0 %v4006_v14 }
 0x1d7   :  { %1109 = vmatprep.subr.bf16.mxu0 %v4011_v15 }
 0x1da   :  { %1110 = vmatpush1.bf16.msra.mxu0 %v4009_v16 }
 0x1db   :  { %1111 = vmatprep.subr.bf16.mxu0 %v4014_v17 }
 0x1de   :  { %1112 = vmatpush1.bf16.msra.mxu0 %v4012_v18 }
 0x1df   :  { %1113 = vmatprep.subr.bf16.mxu0 %v4017_v19 }
 0x1e2   :  { %1114 = vmatpush1.bf16.msra.mxu0 %v4015_v20 }
 0x1e3   :  { %1115 = vmatprep.subr.bf16.mxu0 %v4020_v21 }
 0x1e6   :  { %1116 = vmatpush1.bf16.msra.mxu0 %v4018_v22 }
 0x1e7   :  { %1117 = vmatprep.subr.bf16.mxu0 %v4023_v23 }
 0x1ea   :  { %1118 = vmatpush1.bf16.msra.mxu0 %v4021_v24 }
 0x1eb   :  { %1119 = vmatprep.subr.bf16.mxu0 %v4026_v25 }
 0x1ee   :  { %1120 = vmatpush1.bf16.msra.mxu0 %v4024_v26 }
 0x1ef   :  { %1121 = vmatprep.subr.bf16.mxu0 %v4029_v27 }
 0x1f2   :  { %1122 = vmatpush1.bf16.msra.mxu0 %v4027_v28 }
 0x1f3   :  { %1123 = vmatprep.subr.bf16.mxu0 %v4032_v29 }
 0x1f6   :  { %1124 = vmatpush1.bf16.msra.mxu0 %v4030_v30 }
 0x1f7   :  { %1125 = vmatprep.subr.bf16.mxu0 %v4035_v31 }
 0x1fa   :  { %1126 = vmatpush1.bf16.msra.mxu0 %v4033_v32 }
 0x1fb   :  { %1127 = vmatprep.subr.bf16.mxu0 %v4038_v33 }
 0x1fe   :  { %1128 = vmatpush1.bf16.msra.mxu0 %v4036_v34 }
 0x1ff   :  { %1129 = vmatprep.subr.bf16.mxu0 %v4041_v35 }
 0x202   :  { %1130 = vmatpush1.bf16.msra.mxu0 %v4039_v36 }
 0x203   :  { %1131 = vmatprep.subr.bf16.mxu0 %v4044_v37 }
 0x206   :  { %1132 = vmatpush1.bf16.msra.mxu0 %v4042_v38 }
 0x207   :  { %1133 = vmatprep.subr.bf16.mxu0 %v4047_v39 }
 0x20a   :  { %1134 = vmatpush1.bf16.msra.mxu0 %v4045_v40 }
 0x20b   :  { %1135 = vmatprep.subr.bf16.mxu0 %v4050_v41 }
 0x20e   :  { %1136 = vmatpush1.bf16.msra.mxu0 %v4048_v42 }
 0x20f   :  { %1148 = vmatprep.subr.bf16.mxu0 %v4053_v43 }
 0x2a4   :  { %v597_v55 = vpop.f32.mrb[4].mxu0  ;;  %v640_v56 = vpop.f32.mrb[4].mxu1 }
 0x2a5   :  { %v598_v57 = vadd.f32 %v597_v55, %v386_v51  ;;  %v641_v58 = vadd.f32 %v640_v56, %v394_v52  ;;  %v599_v59 = vpop.f32.mrb[5].mxu0  ;;  %v642_v60 = vpop.f32.mrb[5].mxu1 }
 0x2a6   :  { %v600_v61 = vadd.f32 %v599_v59, %v390_v53  ;;  %v4600_v62 = vadd.f32 %v642_v60, %v398_v54  ;;  %v601_v1 = vpop.f32.mrb[6].mxu0  ;;  %v644_v2 = vpop.f32.mrb[6].mxu1  ;;  %v4056_v59 = vld [vmem:[%s4543_s26 + $0x114] ss:$8 sps:$4 sm:$0xff]   ;;  %v4054_v60 = vld [vmem:[%s4543_s26 + $0x110] ss:$8 sps:$4 sm:$0xff]  }
 0x2a7   :  { %v3232_v3 = vmul.f32 -1.442695, %v598_v57  ;;  %v3234_v4 = vmul.f32 -1.442695, %v641_v58  ;;  %v602_v5 = vadd.f32 %v601_v1, %v386_v51  ;;  %v645_v6 = vadd.f32 %v644_v2, %v394_v52  ;;  %v603_v7 = vpop.f32.mrb[7].mxu0  ;;  %v646_v8 = vpop.f32.mrb[7].mxu1 }
 0x2a8   :  { %v3233_v9 = vmul.f32 -1.442695, %v600_v61  ;;  %v3235_v10 = vmul.f32 -1.442695, %v4600_v62  ;;  %v604_v11 = vadd.f32 %v603_v7, %v390_v53  ;;  %v647_v12 = vadd.f32 %v646_v8, %v398_v54  ;;  %v4062_v1 = vld [vmem:[%s4543_s26 + $0x134] ss:$8 sps:$4 sm:$0xff]  }
 0x2a9   :  { %4307 = vpow2.f32 %v3232_v3  ;;  %v3236_v13 = vmul.f32 -1.442695, %v602_v5  ;;  %v3238_v14 = vmul.f32 -1.442695, %v645_v6  ;;  %v4060_v2 = vld [vmem:[%s4543_s26 + $0x130] ss:$8 sps:$4 sm:$0xff]  }
 0x2aa   :  { %4309 = vpow2.f32 %v3234_v4  ;;  %v3237_v15 = vmul.f32 -1.442695, %v604_v11  ;;  %v3239_v16 = vmul.f32 -1.442695, %v647_v12  ;;  %v4065_v3 = vld [vmem:[%s4543_s26 + $0x144] ss:$8 sps:$4 sm:$0xff]  }
 0x2ab   :  { %4311 = vpow2.f32 %v3233_v9  ;;  %v4063_v4 = vld [vmem:[%s4543_s26 + $0x140] ss:$8 sps:$4 sm:$0xff]   ;;  %v4071_v7 = vld [vmem:[%s4543_s26 + $0x164] ss:$8 sps:$4 sm:$0xff]   ;;  %v4074_v9 = vld [vmem:[%s4543_s26 + $0x174] ss:$8 sps:$4 sm:$0xff]  }
 0x2ac   :  { %4313 = vpow2.f32 %v3235_v10  ;;  %v4069_v8 = vld [vmem:[%s4543_s26 + $0x160] ss:$8 sps:$4 sm:$0xff]   ;;  %v4072_v10 = vld [vmem:[%s4543_s26 + $0x170] ss:$8 sps:$4 sm:$0xff]  }
 0x2ad   :  { %4315 = vpow2.f32 %v3236_v13  ;;  %v4080_v13 = vld [vmem:[%s4543_s26 + $0x194] ss:$8 sps:$4 sm:$0xff]  }
 0x2ae   :  { %4317 = vpow2.f32 %v3238_v14  ;;  %v4078_v14 = vld [vmem:[%s4543_s26 + $0x190] ss:$8 sps:$4 sm:$0xff]  }
 0x2af   :  { %4319 = vpow2.f32 %v3237_v15  ;;  %v4083_v15 = vld [vmem:[%s4543_s26 + $0x1a4] ss:$8 sps:$4 sm:$0xff]  }
 0x2b0   :  { %4321 = vpow2.f32 %v3239_v16  ;;  %v4081_v16 = vld [vmem:[%s4543_s26 + $0x1a0] ss:$8 sps:$4 sm:$0xff]  }
 0x2b3   :  { %v4308_v17 = vpop.eup %4307 }
 0x2b4   :  { %v4310_v18 = vpop.eup %4309  ;;  %v673_v19 = vadd.f32 1.0, %v4308_v17  ;;  %v4086_v17 = vld [vmem:[%s4543_s26 + $0x1b4] ss:$8 sps:$4 sm:$0xff]  }
 0x2b5   :  { %v4312_v20 = vpop.eup %4311  ;;  %v675_v21 = vadd.f32 1.0, %v4310_v18  ;;  %v4084_v18 = vld [vmem:[%s4543_s26 + $0x1b0] ss:$8 sps:$4 sm:$0xff]  }
 0x2b6   :  { %v4314_v22 = vpop.eup %4313  ;;  %4323 = vrcp.f32 %v673_v19  ;;  %v674_v23 = vadd.f32 1.0, %v4312_v20  ;;  %v4089_v19 = vld [vmem:[%s4543_s26 + $0x1c4] ss:$8 sps:$4 sm:$0xff]   ;;  %v4087_v20 = vld [vmem:[%s4543_s26 + $0x1c0] ss:$8 sps:$4 sm:$0xff]  }
 0x2b7   :  { %v4316_v24 = vpop.eup %4315  ;;  %4325 = vrcp.f32 %v675_v21  ;;  %v676_v25 = vadd.f32 1.0, %v4314_v22  ;;  %v4092_v21 = vld [vmem:[%s4543_s26 + $0x1d4] ss:$8 sps:$4 sm:$0xff]   ;;  %v4090_v22 = vld [vmem:[%s4543_s26 + $0x1d0] ss:$8 sps:$4 sm:$0xff]  }
 0x2b8   :  { %v4318_v26 = vpop.eup %4317  ;;  %4327 = vrcp.f32 %v674_v23  ;;  %v677_v27 = vadd.f32 1.0, %v4316_v24  ;;  %v4095_v23 = vld [vmem:[%s4543_s26 + $0x1e4] ss:$8 sps:$4 sm:$0xff]   ;;  %v4093_v24 = vld [vmem:[%s4543_s26 + $0x1e0] ss:$8 sps:$4 sm:$0xff]  }
 0x2b9   :  { %v4320_v28 = vpop.eup %4319  ;;  %4329 = vrcp.f32 %v676_v25  ;;  %v679_v29 = vadd.f32 1.0, %v4318_v26  ;;  %v4098_v25 = vld [vmem:[%s4543_s26 + $0x1f4] ss:$8 sps:$4 sm:$0xff]   ;;  %v4096_v26 = vld [vmem:[%s4543_s26 + $0x1f0] ss:$8 sps:$4 sm:$0xff]  }
 0x2ba   :  { %v4322_v30 = vpop.eup %4321  ;;  %4331 = vrcp.f32 %v677_v27  ;;  %v678_v31 = vadd.f32 1.0, %v4320_v28  ;;  %v4099_v27 = vld [vmem:[%s3165_s8 + $0x40] sm:$0xff]  }
 0x2bb   :  { %4333 = vrcp.f32 %v679_v29  ;;  %v680_v32 = vadd.f32 1.0, %v4322_v30  ;;  %v4100_v28 = vld [vmem:[%s3165_s8] sm:$0xff]   ;;  %3511 = vmatprep.subr.bf16.mxu1 %v4099_v27  ;;  %v4101_v29 = vld [vmem:[%s3165_s8 + $0x48] sm:$0xff]  }
 0x2bc   :  { %4335 = vrcp.f32 %v678_v31  ;;  %3512 = vmatpush3.bf16.msra.mxu1 %v4100_v28  ;;  %v4102_v30 = vld [vmem:[%s3165_s8 + $0x8] sm:$0xff]   ;;  %v4103_v31 = vld [vmem:[%s3165_s8 + $0x50] sm:$0xff]  }
 0x2bd   :  { %4337 = vrcp.f32 %v680_v32  ;;  %3513 = vmatprep.subr.bf16.mxu1 %v4101_v29  ;;  %v4104_v32 = vld [vmem:[%s3165_s8 + $0x10] sm:$0xff]   ;;  %v1418_v29 = vld [vmem:[%s4656_s16 + $0x38] sm:$0xff] }
 0x2be   :  { %v1417_v28 = vld [vmem:[%s4656_s16 + $0x30] sm:$0xff] }
 0x2c0   :  { %v4324_v33 = vpop.eup %4323  ;;  %3514 = vmatpush3.bf16.msra.mxu1 %v4102_v30  ;;  %v3844_v30 = vpack.c.bf16 %v1418_v29, %v1417_v28  ;;  %v4115_v29 = vld [vmem:[%s4702_s28] ss:$16 sps:$4 sm:$0xff]  }
 0x2c1   :  { %v4326_v34 = vpop.eup %4325  ;;  %v697_v39 = vmul.f32 %v4324_v33, %v598_v57  ;;  %v4051_v57 = vld [vmem:[%s4543_s26 + $0x100] ss:$8 sps:$4 sm:$0xff]   ;;  %3515 = vmatprep.subr.bf16.mxu1 %v4103_v31  ;;  %v4105_v33 = vld [vmem:[%s3165_s8 + $0x58] sm:$0xff]  }
 0x2c2   :  { %v4328_v35 = vpop.eup %4327  ;;  %v4603_v42 = vmul.f32 %v4326_v34, %v641_v58  ;;  %v4106_v34 = vld [vmem:[%s3165_s8 + $0x18] sm:$0xff]   ;;  %v1419_v31 = vld [vmem:[%s4656_s16 + $0x40] sm:$0xff] }
 0x2c3   :  { %v4330_v36 = vpop.eup %4329  ;;  %v698_v48 = vmul.f32 %v4328_v35, %v600_v61  ;;  %v4059_v61 = vld [vmem:[%s4543_s26 + $0x124] ss:$8 sps:$4 sm:$0xff]  }
 0x2c4   :  { %v4332_v37 = vpop.eup %4331  ;;  %v700_v53 = vmul.f32 %v4330_v36, %v4600_v62  ;;  %v4057_v62 = vld [vmem:[%s4543_s26 + $0x120] ss:$8 sps:$4 sm:$0xff]   ;;  %3516 = vmatpush3.bf16.msra.mxu1 %v4104_v32 }
 0x2c5   :  { %v4334_v38 = vpop.eup %4333  ;;  %v701_v40 = vmul.f32 %v4332_v37, %v602_v5  ;;  %v4068_v5 = vld [vmem:[%s4543_s26 + $0x154] ss:$8 sps:$4 sm:$0xff]   ;;  %3517 = vmatprep.subr.bf16.mxu1 %v4105_v33  ;;  %v4107_v35 = vld [vmem:[%s3165_s8 + $0x60] sm:$0xff]   ;;  %v4109_v37 = vld [vmem:[%s3165_s8 + $0x68] sm:$0xff]  }
 0x2c6   :  { %v4336_v41 = vpop.eup %4335  ;;  %v4605_v43 = vmul.f32 %v4334_v38, %v645_v6  ;;  %v4066_v6 = vld [vmem:[%s4543_s26 + $0x150] ss:$8 sps:$4 sm:$0xff]   ;;  %v4108_v36 = vld [vmem:[%s3165_s8 + $0x20] sm:$0xff]   ;;  %v4110_v38 = vld [vmem:[%s3165_s8 + $0x28] sm:$0xff]  }
 0x2c7   :  { %v4338_v44 = vpop.eup %4337  ;;  %v769_v51 = vpack.c.bf16 %v701_v40, %v697_v39  ;;  %v702_v52 = vmul.f32 %v4336_v41, %v604_v11  ;;  %v4077_v11 = vld [vmem:[%s4543_s26 + $0x184] ss:$8 sps:$4 sm:$0xff]   ;;  %v4111_v39 = vld [vmem:[%s3165_s8 + $0x70] sm:$0xff]   ;;  %v4113_v41 = vld [vmem:[%s3165_s8 + $0x78] sm:$0xff]  }
 0x2c8   :  { %v771_v54 = vpack.c.bf16 %v4605_v43, %v4603_v42  ;;  %v704_v55 = vmul.f32 %v4338_v44, %v647_v12  ;;  %v4075_v12 = vld [vmem:[%s4543_s26 + $0x180] ss:$8 sps:$4 sm:$0xff]   ;;  %3518 = vmatpush3.bf16.msra.mxu1 %v4106_v34  ;;  %v4112_v40 = vld [vmem:[%s3165_s8 + $0x30] sm:$0xff]   ;;  %v4114_v42 = vld [vmem:[%s3165_s8 + $0x38] sm:$0xff]   ;;  %s4446_s26 = smov 20   ;;  %s4449_s8 = smov 24  }
 0x2c9   :  { %v770_v56 = vpack.c.bf16 %v702_v52, %v698_v48  ;;  %3519 = vmatprep.subr.bf16.mxu1 %v4107_v35  ;;  %v773_v43 = vld [vmem:[%s3164_s12] sm:$0x3]  ;;  %v1420_v32 = vld [vmem:[%s4656_s16 + $0x48] sm:$0xff]  ;;  %v1421_v34 = vld [vmem:[%s4656_s16 + $0x50] sm:$0xff]  ;;  %s3175_s29 = sld [smem:[%s4950_s0 + %s4446_s26]]   ;;  %s4450_s12 = smov 21  }
 0x2ca   :  { %v772_v58 = vpack.c.bf16 %v704_v55, %v700_v53  ;;  %v778_v44 = vrot.slane %v773_v43, %v4587_v46  ;;  %v782_v48 = vrot.slane %v773_v43, %v4591_v49  ;;  %v3848_v33 = vpack.c.bf16 %v1420_v32, %v1419_v31  ;;  %v1422_v35 = vld [vmem:[%s4656_s16 + $0x58] sm:$0xff]  ;;  %v1509_v43 = vld [vmem:[%s4675_s20] sm:$0xff]  ;;  %s4870_s11 = sld [smem:[%s4950_s0 + %s4449_s8]]  }
 0x2cb   :  { %1137 = vmatprep.mubr.bf16.mxu0 %v770_v56  ;;  %v4118_v31 = vld [vmem:[%s4702_s28 + $0x8] ss:$16 sps:$4 sm:$0xff]   ;;  %v4121_v32 = vld [vmem:[%s4702_s28 + $0x20] ss:$16 sps:$4 sm:$0xff]   ;;  %s3176_s15 = sld [smem:[%s4950_s0 + %s4450_s12]]  }
 0x2cc   :  { %1138 = vmatmul.mubr.bf16.vlgmr.msra.gmra.mrb[8].mxu0 %v769_v51  ;;  %3520 = vmatpush3.bf16.msra.mxu1 %v4108_v36  ;;  %v3852_v36 = vpack.c.bf16 %v1422_v35, %v1421_v34  ;;  %v4124_v34 = vld [vmem:[%s4702_s28 + $0x28] ss:$16 sps:$4 sm:$0xff]   ;;  %v4126_v35 = vld [vmem:[%s4702_s28 + $0x2c] ss:$16 sps:$4 sm:$0xff]  }
 0x2cd   :  { %1149 = vmatpush1.bf16.msra.mxu0 %v4051_v57  ;;  %1180 = vmatprep.mubr.bf16.mxu0 %v772_v58 }
 0x2ce   :  { %1150 = vmatprep.subr.bf16.mxu0 %v4056_v59  ;;  %3521 = vmatprep.subr.bf16.mxu1 %v4109_v37  ;;  %v1423_v37 = vld [vmem:[%s4656_s16 + $0x60] sm:$0xff] }
 0x2d0   :  { %3522 = vmatpush3.bf16.msra.mxu1 %v4110_v38  ;;  %v1424_v38 = vld [vmem:[%s4656_s16 + $0x68] sm:$0xff] }
 0x2d1   :  { %1151 = vmatpush1.bf16.msra.mxu0 %v4054_v60  ;;  %3523 = vmatprep.subr.bf16.mxu1 %v4111_v39  ;;  %v3856_v39 = vpack.c.bf16 %v1424_v38, %v1423_v37  ;;  %v4132_v37 = vld [vmem:[%s4702_s28 + $0x4c] ss:$16 sps:$4 sm:$0xff]   ;;  %v4127_v38 = vld [vmem:[%s4702_s28 + $0x40] ss:$16 sps:$4 sm:$0xff]  }
 0x2d2   :  { %1152 = vmatprep.subr.bf16.mxu0 %v4059_v61 }
 0x2d4   :  { %3524 = vmatpush3.bf16.msra.mxu1 %v4112_v40  ;;  %v1425_v40 = vld [vmem:[%s4656_s16 + $0x70] sm:$0xff] }
 0x2d5   :  { %1153 = vmatpush1.bf16.msra.mxu0 %v4057_v62  ;;  %3525 = vmatprep.subr.bf16.mxu1 %v4113_v41  ;;  %v1426_v41 = vld [vmem:[%s4656_s16 + $0x78] sm:$0xff] }
 0x2d6   :  { %1154 = vmatprep.subr.bf16.mxu0 %v4062_v1 }
 0x2d8   :  { %3526 = vmatpush3.bf16.msra.mxu1 %v4114_v42  ;;  %v3860_v42 = vpack.c.bf16 %v1426_v41, %v1425_v40  ;;  %v4135_v40 = vld [vmem:[%s4702_s28 + $0x64] ss:$16 sps:$4 sm:$0xff]   ;;  %v4138_v41 = vld [vmem:[%s4702_s28 + $0x6c] ss:$16 sps:$4 sm:$0xff]  }
 0x2d9   :  { %1155 = vmatpush1.bf16.msra.mxu0 %v4060_v2 }
 0x2da   :  { %1156 = vmatprep.subr.bf16.mxu0 %v4065_v3 }
 0x2dd   :  { %1157 = vmatpush1.bf16.msra.mxu0 %v4063_v4 }
 0x2de   :  { %1158 = vmatprep.subr.bf16.mxu0 %v4068_v5 }
 0x2e1   :  { %1159 = vmatpush1.bf16.msra.mxu0 %v4066_v6 }
 0x2e2   :  { %1160 = vmatprep.subr.bf16.mxu0 %v4071_v7 }
 0x2e5   :  { %1161 = vmatpush1.bf16.msra.mxu0 %v4069_v8 }
 0x2e6   :  { %1162 = vmatprep.subr.bf16.mxu0 %v4074_v9 }
 0x2e9   :  { %1163 = vmatpush1.bf16.msra.mxu0 %v4072_v10 }
 0x2ea   :  { %1164 = vmatprep.subr.bf16.mxu0 %v4077_v11 }
 0x2ed   :  { %1165 = vmatpush1.bf16.msra.mxu0 %v4075_v12 }
 0x2ee   :  { %1166 = vmatprep.subr.bf16.mxu0 %v4080_v13 }
 0x2f1   :  { %1167 = vmatpush1.bf16.msra.mxu0 %v4078_v14 }
 0x2f2   :  { %1168 = vmatprep.subr.bf16.mxu0 %v4083_v15 }
 0x2f5   :  { %1169 = vmatpush1.bf16.msra.mxu0 %v4081_v16 }
 0x2f6   :  { %1170 = vmatprep.subr.bf16.mxu0 %v4086_v17 }
 0x2f9   :  { %1171 = vmatpush1.bf16.msra.mxu0 %v4084_v18 }
 0x2fa   :  { %1172 = vmatprep.subr.bf16.mxu0 %v4089_v19  ;;  %v1411_v19 = vld [vmem:[%s4656_s16] sm:$0xff] }
 0x2fd   :  { %1173 = vmatpush1.bf16.msra.mxu0 %v4087_v20  ;;  %v1412_v20 = vld [vmem:[%s4656_s16 + $0x8] sm:$0xff] }
 0x2fe   :  { %1174 = vmatprep.subr.bf16.mxu0 %v4092_v21  ;;  %v3832_v21 = vpack.c.bf16 %v1412_v20, %v1411_v19  ;;  %v1519_v20 = vld [vmem:[%s4675_s20 + $0x50] sm:$0xff] }
 0x300   :  { %3833 = vmatprep.subr.bf16.mxu1 %v3832_v21 }
 0x301   :  { %1175 = vmatpush1.bf16.msra.mxu0 %v4090_v22  ;;  %v1413_v22 = vld [vmem:[%s4656_s16 + $0x10] sm:$0xff] }
 0x302   :  { %1176 = vmatprep.subr.bf16.mxu0 %v4095_v23  ;;  %v1414_v23 = vld [vmem:[%s4656_s16 + $0x18] sm:$0xff] }
 0x305   :  { %1177 = vmatpush1.bf16.msra.mxu0 %v4093_v24  ;;  %v3836_v24 = vpack.c.bf16 %v1414_v23, %v1413_v22  ;;  %v1521_v23 = vld [vmem:[%s4675_s20 + $0x60] sm:$0xff] }
 0x306   :  { %1178 = vmatprep.subr.bf16.mxu0 %v4098_v25  ;;  %v1415_v25 = vld [vmem:[%s4656_s16 + $0x20] sm:$0xff] }
 0x309   :  { %1179 = vmatpush1.bf16.msra.mxu0 %v4096_v26  ;;  %v1416_v26 = vld [vmem:[%s4656_s16 + $0x28] sm:$0xff]  ;;  %s4451_s16 = smov 26  }
 0x30a   :  { %v3840_v27 = vpack.c.bf16 %v1416_v26, %v1415_v25  ;;  %v1523_v26 = vld [vmem:[%s4675_s20 + $0x70] sm:$0xff]  ;;  %s4896_s19 = sld [smem:[%s4950_s0 + %s4451_s16]]  }
 0x30c   :  { %1181 = vmatmul.mubr.bf16.vlgmr.msra.gmra.mrb[8].mxu0 %v771_v54 }
 0x30d   :  { %1913 = vmatprep.mubr.bf16.mxu0 %v4430_v63 }
 0x3df   :  { %v1182_v51 = vpop.f32.mrb[8].mxu0 }
 0x3e0   :  { %v3896_v52 = vadd.f32 %v1182_v51, %v778_v44  ;;  %v1184_v53 = vpop.f32.mrb[9].mxu0 }
 0x3e1   :  { %v3897_v54 = vadd.f32 %v1184_v53, %v782_v48  ;;  %v1186_v55 = vpop.f32.mrb[10].mxu0 }
 0x3e2   :  { %v3304_v56 = vmul.f32 -1.442695, %v3896_v52  ;;  %v3898_v57 = vadd.f32 %v1186_v55, %v778_v44  ;;  %v1188_v58 = vpop.f32.mrb[11].mxu0  ;;  %v1510_v44 = vld [vmem:[%s4675_s20 + $0x8] sm:$0xff] }
 0x3e3   :  { %v3305_v59 = vmul.f32 -1.442695, %v3897_v54  ;;  %v3899_v60 = vadd.f32 %v1188_v58, %v782_v48  ;;  %v3864_v48 = vpack.c.bf16 %v1510_v44, %v1509_v43  ;;  %v4136_v43 = vld [vmem:[%s4702_s28 + $0x68] ss:$16 sps:$4 sm:$0xff]   ;;  %v4141_v44 = vld [vmem:[%s4702_s28 + $0x84] ss:$16 sps:$4 sm:$0xff]  }
 0x3e4   :  { %4339 = vpow2.f32 %v3304_v56  ;;  %v3306_v61 = vmul.f32 -1.442695, %v3898_v57 }
 0x3e5   :  { %4341 = vpow2.f32 %v3305_v59  ;;  %v3307_v62 = vmul.f32 -1.442695, %v3899_v60 }
 0x3e6   :  { %4343 = vpow2.f32 %v3306_v61 }
 0x3e7   :  { %4345 = vpow2.f32 %v3307_v62 }
 0x3ee   :  { %v4340_v1 = vpop.eup %4339 }
 0x3ef   :  { %v4342_v2 = vpop.eup %4341  ;;  %v1203_v3 = vadd.f32 1.0, %v4340_v1 }
 0x3f0   :  { %v4344_v4 = vpop.eup %4343  ;;  %v1204_v5 = vadd.f32 1.0, %v4342_v2 }
 0x3f1   :  { %v4346_v6 = vpop.eup %4345  ;;  %4347 = vrcp.f32 %v1203_v3  ;;  %v1205_v7 = vadd.f32 1.0, %v4344_v4 }
 0x3f2   :  { %4349 = vrcp.f32 %v1204_v5  ;;  %v1206_v8 = vadd.f32 1.0, %v4346_v6  ;;  %v1511_v5 = vld [vmem:[%s4675_s20 + $0x10] sm:$0xff]  ;;  %v1512_v6 = vld [vmem:[%s4675_s20 + $0x18] sm:$0xff] }
 0x3f3   :  { %4351 = vrcp.f32 %v1205_v7 }
 0x3f4   :  { %4353 = vrcp.f32 %v1206_v8 }
 0x3fb   :  { %v4348_v9 = vpop.eup %4347 }
 0x3fc   :  { %v4350_v10 = vpop.eup %4349  ;;  %v1215_v13 = vmul.f32 %v4348_v9, %v3896_v52  ;;  %v3308_v52 = vld [vmem:[%s3166_s24] ss:$0 sm:$0xff]  ;;  %s4453_s24 = smov 28  }
 0x3fd   :  { %v4352_v11 = vpop.eup %4351  ;;  %v1216_v15 = vmul.f32 %v4350_v10, %v3897_v54  ;;  %v3868_v10 = vpack.c.bf16 %v1512_v6, %v1511_v5  ;;  %s4921_s27 = sld [smem:[%s4950_s0 + %s4453_s24]]  }
 0x3fe   :  { %v4354_v12 = vpop.eup %4353  ;;  %v1217_v14 = vmul.f32 %v4352_v11, %v3898_v57  ;;  %v1513_v11 = vld [vmem:[%s4675_s20 + $0x20] sm:$0xff] }
 0x3ff   :  { %v1218_v16 = vmul.f32 %v4354_v12, %v3899_v60  ;;  %v1514_v12 = vld [vmem:[%s4675_s20 + $0x28] sm:$0xff] }
 0x400   :  { %v1251_v17 = vpack.c.bf16 %v1217_v14, %v1215_v13  ;;  %v3872_v13 = vpack.c.bf16 %v1514_v12, %v1513_v11  ;;  %v1515_v14 = vld [vmem:[%s4675_s20 + $0x30] sm:$0xff] }
 0x401   :  { %v1252_v18 = vpack.c.bf16 %v1218_v16, %v1216_v15  ;;  %v1516_v15 = vld [vmem:[%s4675_s20 + $0x38] sm:$0xff] }
 0x402   :  { %v3876_v16 = vpack.c.bf16 %v1516_v15, %v1515_v14 }
 0x403   :  { %1388 = vmatprep.mubr.bf16.mxu1 %v1252_v18  ;;  %v1518_v18 = vld [vmem:[%s4675_s20 + $0x48] sm:$0xff] }
 0x404   :  { %1389 = vmatmul.mubr.bf16.vlgmr.msra.gmra.mrb[8].mxu1 %v1251_v17  ;;  %v1517_v17 = vld [vmem:[%s4675_s20 + $0x40] sm:$0xff] }
 0x405   :  { %3835 = vmatpush3.bf16.msra.mxu1 %v3832_v21  ;;  %v3880_v19 = vpack.c.bf16 %v1518_v18, %v1517_v17  ;;  %v1520_v21 = vld [vmem:[%s4675_s20 + $0x58] sm:$0xff]  ;;  %v1612_v18 = vld [vmem:[%s1_s21 + $0x8] sm:$0xff] }
 0x406   :  { %3837 = vmatprep.subr.bf16.mxu1 %v3836_v24  ;;  %v3884_v22 = vpack.c.bf16 %v1520_v21, %v1519_v20 }
 0x409   :  { %3839 = vmatpush3.bf16.msra.mxu1 %v3836_v24  ;;  %v1522_v24 = vld [vmem:[%s4675_s20 + $0x68] sm:$0xff] }
 0x40a   :  { %3841 = vmatprep.subr.bf16.mxu1 %v3840_v27  ;;  %v3888_v25 = vpack.c.bf16 %v1522_v24, %v1521_v23 }
 0x40d   :  { %3843 = vmatpush3.bf16.msra.mxu1 %v3840_v27  ;;  %v1524_v27 = vld [vmem:[%s4675_s20 + $0x78] sm:$0xff]  ;;  %s4452_s20 = smov 23  }
 0x40e   :  { %3845 = vmatprep.subr.bf16.mxu1 %v3844_v30  ;;  %v3892_v28 = vpack.c.bf16 %v1524_v27, %v1523_v26  ;;  %v4163_v26 = vld [vmem:[%s4739_s2] ss:$8 sps:$4 sm:$0xff]   ;;  %s3178_s23 = sld [smem:[%s4950_s0 + %s4452_s20]]  }
 0x411   :  { %3847 = vmatpush3.bf16.msra.mxu1 %v3844_v30  ;;  %v4117_v30 = vld [vmem:[%s4702_s28 + $0x4] ss:$16 sps:$4 sm:$0xff]  }
 0x412   :  { %3849 = vmatprep.subr.bf16.mxu1 %v3848_v33 }
 0x415   :  { %3851 = vmatpush3.bf16.msra.mxu1 %v3848_v33  ;;  %v4123_v33 = vld [vmem:[%s4702_s28 + $0x24] ss:$16 sps:$4 sm:$0xff]  }
 0x416   :  { %3853 = vmatprep.subr.bf16.mxu1 %v3852_v36 }
 0x419   :  { %3855 = vmatpush3.bf16.msra.mxu1 %v3852_v36  ;;  %v4129_v36 = vld [vmem:[%s4702_s28 + $0x44] ss:$16 sps:$4 sm:$0xff]  }
 0x41a   :  { %3857 = vmatprep.subr.bf16.mxu1 %v3856_v39 }
 0x41d   :  { %3859 = vmatpush3.bf16.msra.mxu1 %v3856_v39  ;;  %v4130_v39 = vld [vmem:[%s4702_s28 + $0x48] ss:$16 sps:$4 sm:$0xff]  }
 0x41e   :  { %3861 = vmatprep.subr.bf16.mxu1 %v3860_v42 }
 0x421   :  { %3863 = vmatpush3.bf16.msra.mxu1 %v3860_v42  ;;  %v4133_v42 = vld [vmem:[%s4702_s28 + $0x60] ss:$16 sps:$4 sm:$0xff]  }
 0x422   :  { %3865 = vmatprep.subr.bf16.mxu1 %v3864_v48 }
 0x4d7   :  { %v3527_v51 = vpop.f32.mrb[8].mxu1 }
 0x4d8   :  { %v3528_v53 = vpop.f32.mrb[9].mxu1 }
 0x4d9   :  { %v3529_v54 = vadd.f32 %v3528_v53, %v3527_v51  ;;  %v3530_v55 = vpop.f32.mrb[10].mxu1  ;;  %v4139_v51 = vld [vmem:[%s4702_s28 + $0x80] ss:$16 sps:$4 sm:$0xff]   ;;  %v4147_v53 = vld [vmem:[%s4702_s28 + $0xa4] ss:$16 sps:$4 sm:$0xff]  }
 0x4da   :  { %v3531_v56 = vpop.f32.mrb[11].mxu1 }
 0x4db   :  { %v1391_v57 = vadd.f32 %v3529_v54, %v3308_v52  ;;  %v3532_v58 = vadd.f32 %v3531_v56, %v3530_v55  ;;  %v4150_v54 = vld [vmem:[%s4702_s28 + $0xac] ss:$16 sps:$4 sm:$0xff]   ;;  %v4145_v55 = vld [vmem:[%s4702_s28 + $0xa0] ss:$16 sps:$4 sm:$0xff]   ;;  %v4148_v56 = vld [vmem:[%s4702_s28 + $0xa8] ss:$16 sps:$4 sm:$0xff]  }
 0x4dd   :  { %v3325_v59 = vmul.f32 -1.442695, %v1391_v57  ;;  %v1394_v60 = vadd.f32 %v3532_v58, %v3308_v52  ;;  %v4142_v52 = vld [vmem:[%s4702_s28 + $0x88] ss:$16 sps:$4 sm:$0xff]   ;;  %v4156_v58 = vld [vmem:[%s4702_s28 + $0xcc] ss:$16 sps:$4 sm:$0xff]  }
 0x4df   :  { %4355 = vpow2.f32 %v3325_v59  ;;  %v3326_v61 = vmul.f32 -1.442695, %v1394_v60  ;;  %v4151_v59 = vld [vmem:[%s4702_s28 + $0xc0] ss:$16 sps:$4 sm:$0xff]  }
 0x4e1   :  { %4357 = vpow2.f32 %v3326_v61  ;;  %v4159_v61 = vld [vmem:[%s4702_s28 + $0xe4] ss:$16 sps:$4 sm:$0xff]  }
 0x4e9   :  { %v4356_v62 = vpop.eup %4355 }
 0x4ea   :  { %v1403_v1 = vadd.f32 1.0, %v4356_v62  ;;  %v4162_v62 = vld [vmem:[%s4702_s28 + $0xec] ss:$16 sps:$4 sm:$0xff]  }
 0x4eb   :  { %v4358_v2 = vpop.eup %4357 }
 0x4ec   :  { %4359 = vrcp.f32 %v1403_v1  ;;  %v1404_v3 = vadd.f32 1.0, %v4358_v2  ;;  %v4157_v1 = vld [vmem:[%s4702_s28 + $0xe0] ss:$16 sps:$4 sm:$0xff]   ;;  %v4160_v2 = vld [vmem:[%s4702_s28 + $0xe8] ss:$16 sps:$4 sm:$0xff]  }
 0x4ee   :  { %4361 = vrcp.f32 %v1404_v3  ;;  %v4165_v3 = vld [vmem:[%s4739_s2 + $0x4] ss:$8 sps:$4 sm:$0xff]  }
 0x4f6   :  { %v4360_v4 = vpop.eup %4359 }
 0x4f7   :  { %v1409_v7 = vmul.f32 %v4360_v4, %v1391_v57  ;;  %v4153_v57 = vld [vmem:[%s4702_s28 + $0xc4] ss:$16 sps:$4 sm:$0xff]   ;;  %v3327_v4 = vld [vmem:[%s3168_s6] ss:$0 sm:$0xff]  ;;  %s4456_s6 = smov 29  }
 0x4f8   :  { %v4362_v8 = vpop.eup %4361  ;;  %s3184_s9 = sld [smem:[%s4950_s0 + %s4456_s6]]  }
 0x4f9   :  { %v1410_v9 = vmul.f32 %v4362_v8, %v1394_v60  ;;  %3698 = vmatprep.mubr.f32.mxu1 %v1409_v7  ;;  %v4154_v60 = vld [vmem:[%s4702_s28 + $0xc8] ss:$16 sps:$4 sm:$0xff]  }
 0x4fb   :  { %3699 = vmatmul.mubr.f32.vlgmr.msra.gmra.mrb[12].mxu1 %v1410_v9 }
 0x4fc   :  { %3867 = vmatpush3.bf16.msra.mxu1 %v3864_v48  ;;  %3733 = vmatprep.mubr.f32.mxu1 %v1409_v7  ;;  %v4144_v48 = vld [vmem:[%s4702_s28 + $0x8c] ss:$16 sps:$4 sm:$0xff]  }
 0x4fd   :  { %3869 = vmatprep.subr.bf16.mxu1 %v3868_v10 }
 0x500   :  { %3871 = vmatpush3.bf16.msra.mxu1 %v3868_v10 }
 0x501   :  { %3873 = vmatprep.subr.bf16.mxu1 %v3872_v13 }
 0x504   :  { %3875 = vmatpush3.bf16.msra.mxu1 %v3872_v13 }
 0x505   :  { %3877 = vmatprep.subr.bf16.mxu1 %v3876_v16 }
 0x508   :  { %3879 = vmatpush3.bf16.msra.mxu1 %v3876_v16 }
 0x509   :  { %3881 = vmatprep.subr.bf16.mxu1 %v3880_v19 }
 0x50c   :  { %3883 = vmatpush3.bf16.msra.mxu1 %v3880_v19  ;;  %v1611_v19 = vld [vmem:[%s1_s21] sm:$0xff] }
 0x50d   :  { %3885 = vmatprep.subr.bf16.mxu1 %v3884_v22 }
 0x510   :  { %3887 = vmatpush3.bf16.msra.mxu1 %v3884_v22 }
 0x511   :  { %3889 = vmatprep.subr.bf16.mxu1 %v3888_v25 }
 0x514   :  { %3891 = vmatpush3.bf16.msra.mxu1 %v3888_v25 }
 0x515   :  { %3893 = vmatprep.subr.bf16.mxu1 %v3892_v28 }
 0x518   :  { %3895 = vmatpush3.bf16.msra.mxu1 %v3892_v28  ;;  %v4168_v28 = vld [vmem:[%s4739_s2 + $0x14] ss:$8 sps:$4 sm:$0xff]  }
 0x519   :  { %1838 = vmatprep.subr.bf16.mxu1 %v4117_v30  ;;  %v4171_v30 = vld [vmem:[%s4739_s2 + $0x24] ss:$8 sps:$4 sm:$0xff]  }
 0x51b   :  { %3734 = vmatmul.mubr.f32.vlgmr.msra.gmra.mrb[14].mxu1 %v1410_v9  ;;  %v3328_v9 = vld [vmem:[%s3170_s14] ss:$0 sm:$0xff] }
 0x51c   :  { %1870 = vmatprep.mubr.bf16.mxu1 %v4430_v63  ;;  %v4120_v63 = vld [vmem:[%s4702_s28 + $0xc] ss:$16 sps:$4 sm:$0xff]   ;;  %1839 = vmatpush1.bf16.msra.mxu1 %v4115_v29  ;;  %v4166_v29 = vld [vmem:[%s4739_s2 + $0x10] ss:$8 sps:$4 sm:$0xff]   ;;  %s4454_s28 = smov 25  }
 0x51d   :  { %1881 = vmatprep.subr.bf16.mxu0 %v4120_v63  ;;  %1840 = vmatprep.subr.bf16.mxu1 %v4123_v33  ;;  %v4174_v63 = vld [vmem:[%s4739_s2 + $0x34] ss:$8 sps:$4 sm:$0xff]   ;;  %v4177_v33 = vld [vmem:[%s4739_s2 + $0x44] ss:$8 sps:$4 sm:$0xff]   ;;  %s3180_s1 = sld [smem:[%s4950_s0 + %s4454_s28]]  }
 0x51e   :  { %1882 = vmatpush1.bf16.msra.mxu0 %v4118_v31  ;;  %v4169_v31 = vld [vmem:[%s4739_s2 + $0x20] ss:$8 sps:$4 sm:$0xff]  }
 0x51f   :  { %1883 = vmatprep.subr.bf16.mxu0 %v4126_v35  ;;  %v4180_v35 = vld [vmem:[%s4739_s2 + $0x54] ss:$8 sps:$4 sm:$0xff]  }
 0x520   :  { %1841 = vmatpush1.bf16.msra.mxu1 %v4121_v32  ;;  %v4172_v32 = vld [vmem:[%s4739_s2 + $0x30] ss:$8 sps:$4 sm:$0xff]  }
 0x521   :  { %1842 = vmatprep.subr.bf16.mxu1 %v4129_v36  ;;  %v4178_v36 = vld [vmem:[%s4739_s2 + $0x50] ss:$8 sps:$4 sm:$0xff]  }
 0x522   :  { %1884 = vmatpush1.bf16.msra.mxu0 %v4124_v34  ;;  %v4175_v34 = vld [vmem:[%s4739_s2 + $0x40] ss:$8 sps:$4 sm:$0xff]  }
 0x523   :  { %1885 = vmatprep.subr.bf16.mxu0 %v4132_v37  ;;  %v4183_v37 = vld [vmem:[%s4739_s2 + $0x64] ss:$8 sps:$4 sm:$0xff]  }
 0x524   :  { %1843 = vmatpush1.bf16.msra.mxu1 %v4127_v38  ;;  %v4181_v38 = vld [vmem:[%s4739_s2 + $0x60] ss:$8 sps:$4 sm:$0xff]  }
 0x525   :  { %1844 = vmatprep.subr.bf16.mxu1 %v4135_v40  ;;  %v4184_v40 = vld [vmem:[%s4739_s2 + $0x70] ss:$8 sps:$4 sm:$0xff]  }
 0x526   :  { %1886 = vmatpush1.bf16.msra.mxu0 %v4130_v39  ;;  %v4186_v39 = vld [vmem:[%s4739_s2 + $0x74] ss:$8 sps:$4 sm:$0xff]  }
 0x527   :  { %1887 = vmatprep.subr.bf16.mxu0 %v4138_v41  ;;  %v4189_v41 = vld [vmem:[%s4739_s2 + $0x84] ss:$8 sps:$4 sm:$0xff]  }
 0x528   :  { %1845 = vmatpush1.bf16.msra.mxu1 %v4133_v42  ;;  %v4187_v42 = vld [vmem:[%s4739_s2 + $0x80] ss:$8 sps:$4 sm:$0xff]  }
 0x529   :  { %1846 = vmatprep.subr.bf16.mxu1 %v4141_v44  ;;  %v4190_v44 = vld [vmem:[%s4739_s2 + $0x90] ss:$8 sps:$4 sm:$0xff]  }
 0x52a   :  { %1888 = vmatpush1.bf16.msra.mxu0 %v4136_v43  ;;  %v4192_v43 = vld [vmem:[%s4739_s2 + $0x94] ss:$8 sps:$4 sm:$0xff]  }
 0x52b   :  { %1889 = vmatprep.subr.bf16.mxu0 %v4144_v48  ;;  %v4195_v48 = vld [vmem:[%s4739_s2 + $0xa4] ss:$8 sps:$4 sm:$0xff]  }
 0x52c   :  { %1847 = vmatpush1.bf16.msra.mxu1 %v4139_v51  ;;  %v4193_v51 = vld [vmem:[%s4739_s2 + $0xa0] ss:$8 sps:$4 sm:$0xff]  }
 0x52d   :  { %1848 = vmatprep.subr.bf16.mxu1 %v4147_v53  ;;  %v4196_v53 = vld [vmem:[%s4739_s2 + $0xb0] ss:$8 sps:$4 sm:$0xff]  }
 0x52e   :  { %1890 = vmatpush1.bf16.msra.mxu0 %v4142_v52  ;;  %v4198_v52 = vld [vmem:[%s4739_s2 + $0xb4] ss:$8 sps:$4 sm:$0xff]  }
 0x52f   :  { %1891 = vmatprep.subr.bf16.mxu0 %v4150_v54  ;;  %v4201_v54 = vld [vmem:[%s4739_s2 + $0xc4] ss:$8 sps:$4 sm:$0xff]  }
 0x530   :  { %1849 = vmatpush1.bf16.msra.mxu1 %v4145_v55  ;;  %v4199_v55 = vld [vmem:[%s4739_s2 + $0xc0] ss:$8 sps:$4 sm:$0xff]  }
 0x531   :  { %1850 = vmatprep.subr.bf16.mxu1 %v4153_v57  ;;  %v4202_v57 = vld [vmem:[%s4739_s2 + $0xd0] ss:$8 sps:$4 sm:$0xff]  }
 0x532   :  { %1892 = vmatpush1.bf16.msra.mxu0 %v4148_v56  ;;  %v4204_v56 = vld [vmem:[%s4739_s2 + $0xd4] ss:$8 sps:$4 sm:$0xff]  }
 0x533   :  { %1893 = vmatprep.subr.bf16.mxu0 %v4156_v58  ;;  %v4207_v58 = vld [vmem:[%s4739_s2 + $0xe4] ss:$8 sps:$4 sm:$0xff]  }
 0x534   :  { %1851 = vmatpush1.bf16.msra.mxu1 %v4151_v59  ;;  %v4205_v59 = vld [vmem:[%s4739_s2 + $0xe0] ss:$8 sps:$4 sm:$0xff]  }
 0x535   :  { %1852 = vmatprep.subr.bf16.mxu1 %v4159_v61  ;;  %v4208_v61 = vld [vmem:[%s4739_s2 + $0xf0] ss:$8 sps:$4 sm:$0xff]  }
 0x536   :  { %1894 = vmatpush1.bf16.msra.mxu0 %v4154_v60  ;;  %v4210_v60 = vld [vmem:[%s4739_s2 + $0xf4] ss:$8 sps:$4 sm:$0xff]  }
 0x537   :  { %1895 = vmatprep.subr.bf16.mxu0 %v4162_v62  ;;  %v4213_v62 = vld [vmem:[%s4739_s2 + $0x104] ss:$8 sps:$4 sm:$0xff]  }
 0x538   :  { %1853 = vmatpush1.bf16.msra.mxu1 %v4157_v1  ;;  %v1656_v1 = vld [vmem:[%s3172_s25] sm:$0xf] }
 0x539   :  { %2380 = vmatprep.subr.bf16.mxu1 %v4165_v3  ;;  %v1669_v3 = vrot.slane %v1656_v1, %v393_v47 }
 0x53a   :  { %1896 = vmatpush1.bf16.msra.mxu0 %v4160_v2  ;;  %v1661_v2 = vrot.slane %v1656_v1, %v4587_v46 }
 0x5ce   :  { %v3700_v5 = vpop.f32.mrb[12].mxu1 }
 0x5cf   :  { %v1506_v6 = vadd.f32 %v3700_v5, %v3327_v4  ;;  %v1500_v7 = vpop.f32.mrb[13].mxu1  ;;  %v1673_v5 = vrot.slane %v1656_v1, %v397_v50 }
 0x5d0   :  { %v1501_v8 = vadd.f32 %v3327_v4, %v1500_v7  ;;  %v1665_v4 = vrot.slane %v1656_v1, %v4591_v49 }
 0x5d1   :  { %1608 = vst [vmem:[%s3186_s10 + $0x8] sm:$0xff] %v1506_v6 }
 0x5d2   :  { %1607 = vst [vmem:[%s3186_s10] sm:$0xff] %v1501_v8  ;;  %s4457_s10 = smov 30  }
 0x5d3   :  { %s3185_s13 = sld [smem:[%s4950_s0 + %s4457_s10]]  }
 0x5ee   :  { %v3735_v10 = vpop.f32.mrb[14].mxu1 }
 0x5ef   :  { %v1604_v11 = vadd.f32 %v3735_v10, %v3328_v9  ;;  %v1598_v12 = vpop.f32.mrb[15].mxu1 }
 0x5f0   :  { %v1599_v13 = vadd.f32 %v3328_v9, %v1598_v12 }
 0x5f1   :  { %1610 = vst [vmem:[%s3187_s18 + $0x8] sm:$0xff] %v1604_v11  ;;  %v1614_v14 = vmul.f32 0.5, %v1604_v11 }
 0x5f2   :  { %1609 = vst [vmem:[%s3187_s18] sm:$0xff] %v1599_v13  ;;  %v1613_v15 = vmul.f32 0.5, %v1599_v13 }
 0x5f3   :  { %v1617_v16 = vmul.f32 1.442695, %v1614_v14 }
 0x5f4   :  { %v1615_v17 = vmul.f32 1.442695, %v1613_v15 }
 0x5f5   :  { %4363 = vpow2.f32 %v1617_v16 }
 0x5f6   :  { %4365 = vpow2.f32 %v1615_v17 }
 0x5ff   :  { %v4364_v20 = vpop.eup %4363 }
 0x600   :  { %v4366_v21 = vpop.eup %4365  ;;  %v1620_v22 = vmul.f32 %v4364_v20, %v1612_v18 }
 0x601   :  { %v1619_v23 = vmul.f32 %v4366_v21, %v1611_v19 }
 0x602   :  { %v1622_v24 = vadd.f32 %v1620_v22, %v1506_v6 }
 0x603   :  { %v1621_v25 = vadd.f32 %v1619_v23, %v1501_v8 }
 0x605   :  { %v1655_v27 = vpack.c.bf16 %v1622_v24, %v1621_v25 }
 0x607   :  { %1871 = vmatmul.mubr.bf16.vlgmr.msra.gmra.mrb[16].mxu1 %v1655_v27  ;;  %1914 = vmatmul.mubr.bf16.vlgmr.msra.gmra.mrb[12].mxu0 %v1655_v27 }
 0x608   :  { %2381 = vmatpush1.bf16.msra.mxu1 %v4163_v26 }
 0x609   :  { %2382 = vmatprep.subr.bf16.mxu1 %v4168_v28 }
 0x60c   :  { %2383 = vmatpush1.bf16.msra.mxu1 %v4166_v29 }
 0x60d   :  { %2384 = vmatprep.subr.bf16.mxu1 %v4171_v30 }
 0x610   :  { %2385 = vmatpush1.bf16.msra.mxu1 %v4169_v31 }
 0x611   :  { %2386 = vmatprep.subr.bf16.mxu1 %v4174_v63 }
 0x614   :  { %2387 = vmatpush1.bf16.msra.mxu1 %v4172_v32 }
 0x615   :  { %2388 = vmatprep.subr.bf16.mxu1 %v4177_v33 }
 0x618   :  { %2389 = vmatpush1.bf16.msra.mxu1 %v4175_v34 }
 0x619   :  { %2390 = vmatprep.subr.bf16.mxu1 %v4180_v35 }
 0x61c   :  { %2391 = vmatpush1.bf16.msra.mxu1 %v4178_v36 }
 0x61d   :  { %2392 = vmatprep.subr.bf16.mxu1 %v4183_v37 }
 0x620   :  { %2393 = vmatpush1.bf16.msra.mxu1 %v4181_v38 }
 0x621   :  { %2394 = vmatprep.subr.bf16.mxu1 %v4186_v39 }
 0x624   :  { %2395 = vmatpush1.bf16.msra.mxu1 %v4184_v40 }
 0x625   :  { %2396 = vmatprep.subr.bf16.mxu1 %v4189_v41 }
 0x628   :  { %2397 = vmatpush1.bf16.msra.mxu1 %v4187_v42 }
 0x629   :  { %2398 = vmatprep.subr.bf16.mxu1 %v4192_v43 }
 0x62c   :  { %2399 = vmatpush1.bf16.msra.mxu1 %v4190_v44 }
 0x62d   :  { %2400 = vmatprep.subr.bf16.mxu1 %v4195_v48 }
 0x630   :  { %2401 = vmatpush1.bf16.msra.mxu1 %v4193_v51 }
 0x631   :  { %2402 = vmatprep.subr.bf16.mxu1 %v4198_v52 }
 0x634   :  { %2403 = vmatpush1.bf16.msra.mxu1 %v4196_v53 }
 0x635   :  { %2404 = vmatprep.subr.bf16.mxu1 %v4201_v54 }
 0x638   :  { %2405 = vmatpush1.bf16.msra.mxu1 %v4199_v55 }
 0x639   :  { %2406 = vmatprep.subr.bf16.mxu1 %v4204_v56 }
 0x63c   :  { %2407 = vmatpush1.bf16.msra.mxu1 %v4202_v57 }
 0x63d   :  { %2408 = vmatprep.subr.bf16.mxu1 %v4207_v58 }
 0x640   :  { %2409 = vmatpush1.bf16.msra.mxu1 %v4205_v59 }
 0x641   :  { %2410 = vmatprep.subr.bf16.mxu1 %v4210_v60 }
 0x644   :  { %2411 = vmatpush1.bf16.msra.mxu1 %v4208_v61 }
 0x645   :  { %2423 = vmatprep.subr.bf16.mxu1 %v4213_v62 }
 0x6da   :  { %v1872_v6 = vpop.f32.mrb[16].mxu1  ;;  %v1915_v7 = vpop.f32.mrb[12].mxu0 }
 0x6db   :  { %v1873_v8 = vadd.f32 %v1872_v6, %v1661_v2  ;;  %v1916_v9 = vadd.f32 %v1915_v7, %v1669_v3  ;;  %v1874_v10 = vpop.f32.mrb[17].mxu1  ;;  %v1917_v11 = vpop.f32.mrb[13].mxu0  ;;  %v4216_v6 = vld [vmem:[%s4739_s2 + $0x114] ss:$8 sps:$4 sm:$0xff]   ;;  %v4214_v7 = vld [vmem:[%s4739_s2 + $0x110] ss:$8 sps:$4 sm:$0xff]  }
 0x6dc   :  { %v1875_v12 = vadd.f32 %v1874_v10, %v1665_v4  ;;  %v4798_v13 = vadd.f32 %v1917_v11, %v1673_v5  ;;  %v1876_v14 = vpop.f32.mrb[18].mxu1  ;;  %v1919_v15 = vpop.f32.mrb[14].mxu0  ;;  %v4222_v10 = vld [vmem:[%s4739_s2 + $0x134] ss:$8 sps:$4 sm:$0xff]   ;;  %v4220_v11 = vld [vmem:[%s4739_s2 + $0x130] ss:$8 sps:$4 sm:$0xff]  }
 0x6dd   :  { %v3361_v16 = vmul.f32 -1.442695, %v1873_v8  ;;  %v3363_v17 = vmul.f32 -1.442695, %v1916_v9  ;;  %v1877_v18 = vadd.f32 %v1876_v14, %v1661_v2  ;;  %v1920_v47 = vadd.f32 %v1919_v15, %v1669_v3  ;;  %v1878_v19 = vpop.f32.mrb[19].mxu1  ;;  %v1921_v20 = vpop.f32.mrb[15].mxu0 }
 0x6de   :  { %v3362_v21 = vmul.f32 -1.442695, %v1875_v12  ;;  %v3364_v45 = vmul.f32 -1.442695, %v4798_v13  ;;  %v1879_v50 = vadd.f32 %v1878_v19, %v1665_v4  ;;  %v1922_v22 = vadd.f32 %v1921_v20, %v1673_v5  ;;  %v4211_v4 = vld [vmem:[%s4739_s2 + $0x100] ss:$8 sps:$4 sm:$0xff]  }
 0x6df   :  { %4367 = vpow2.f32 %v3361_v16  ;;  %v3365_v23 = vmul.f32 -1.442695, %v1877_v18  ;;  %v3367_v24 = vmul.f32 -1.442695, %v1920_v47  ;;  %v4228_v14 = vld [vmem:[%s4739_s2 + $0x154] ss:$8 sps:$4 sm:$0xff]  }
 0x6e0   :  { %4369 = vpow2.f32 %v3363_v17  ;;  %v3366_v25 = vmul.f32 -1.442695, %v1879_v50  ;;  %v3368_v26 = vmul.f32 -1.442695, %v1922_v22  ;;  %v4226_v15 = vld [vmem:[%s4739_s2 + $0x150] ss:$8 sps:$4 sm:$0xff]  }
 0x6e1   :  { %4371 = vpow2.f32 %v3362_v21  ;;  %v4231_v16 = vld [vmem:[%s4739_s2 + $0x164] ss:$8 sps:$4 sm:$0xff]   ;;  %v4229_v17 = vld [vmem:[%s4739_s2 + $0x160] ss:$8 sps:$4 sm:$0xff]   ;;  %v4240_v21 = vld [vmem:[%s4739_s2 + $0x194] ss:$8 sps:$4 sm:$0xff]  }
 0x6e2   :  { %4373 = vpow2.f32 %v3364_v45  ;;  %v4237_v19 = vld [vmem:[%s4739_s2 + $0x184] ss:$8 sps:$4 sm:$0xff]   ;;  %v4235_v20 = vld [vmem:[%s4739_s2 + $0x180] ss:$8 sps:$4 sm:$0xff]   ;;  %v4238_v45 = vld [vmem:[%s4739_s2 + $0x190] ss:$8 sps:$4 sm:$0xff]  }
 0x6e3   :  { %4375 = vpow2.f32 %v3365_v23  ;;  %v4246_v23 = vld [vmem:[%s4739_s2 + $0x1b4] ss:$8 sps:$4 sm:$0xff]  }
 0x6e4   :  { %4377 = vpow2.f32 %v3367_v24  ;;  %v4244_v24 = vld [vmem:[%s4739_s2 + $0x1b0] ss:$8 sps:$4 sm:$0xff]  }
 0x6e5   :  { %4379 = vpow2.f32 %v3366_v25  ;;  %v4249_v25 = vld [vmem:[%s4739_s2 + $0x1c4] ss:$8 sps:$4 sm:$0xff]  }
 0x6e6   :  { %4381 = vpow2.f32 %v3368_v26  ;;  %v4247_v26 = vld [vmem:[%s4739_s2 + $0x1c0] ss:$8 sps:$4 sm:$0xff]  }
 0x6e9   :  { %v4368_v27 = vpop.eup %4367 }
 0x6ea   :  { %v4370_v28 = vpop.eup %4369  ;;  %v1948_v29 = vadd.f32 1.0, %v4368_v27  ;;  %v4252_v27 = vld [vmem:[%s4739_s2 + $0x1d4] ss:$8 sps:$4 sm:$0xff]  }
 0x6eb   :  { %v4372_v30 = vpop.eup %4371  ;;  %v1950_v31 = vadd.f32 1.0, %v4370_v28  ;;  %v4250_v28 = vld [vmem:[%s4739_s2 + $0x1d0] ss:$8 sps:$4 sm:$0xff]  }
 0x6ec   :  { %v4374_v63 = vpop.eup %4373  ;;  %4383 = vrcp.f32 %v1948_v29  ;;  %v1949_v32 = vadd.f32 1.0, %v4372_v30  ;;  %v4255_v29 = vld [vmem:[%s4739_s2 + $0x1e4] ss:$8 sps:$4 sm:$0xff]   ;;  %v4253_v30 = vld [vmem:[%s4739_s2 + $0x1e0] ss:$8 sps:$4 sm:$0xff]  }
 0x6ed   :  { %v4376_v33 = vpop.eup %4375  ;;  %4385 = vrcp.f32 %v1950_v31  ;;  %v1951_v34 = vadd.f32 1.0, %v4374_v63  ;;  %v4258_v31 = vld [vmem:[%s4739_s2 + $0x1f4] ss:$8 sps:$4 sm:$0xff]   ;;  %v4256_v63 = vld [vmem:[%s4739_s2 + $0x1f0] ss:$8 sps:$4 sm:$0xff]  }
 0x6ee   :  { %v4378_v35 = vpop.eup %4377  ;;  %4387 = vrcp.f32 %v1949_v32  ;;  %v1952_v36 = vadd.f32 1.0, %v4376_v33  ;;  %v4259_v32 = vld [vmem:[%s3175_s29 + $0x40] sm:$0xff]  }
 0x6ef   :  { %v4380_v37 = vpop.eup %4379  ;;  %4389 = vrcp.f32 %v1951_v34  ;;  %v1954_v38 = vadd.f32 1.0, %v4378_v35  ;;  %v4260_v33 = vld [vmem:[%s3175_s29] sm:$0xff]   ;;  %3569 = vmatprep.subr.bf16.mxu0 %v4259_v32  ;;  %v4261_v34 = vld [vmem:[%s3175_s29 + $0x48] sm:$0xff]  }
 0x6f0   :  { %v4382_v39 = vpop.eup %4381  ;;  %4391 = vrcp.f32 %v1952_v36  ;;  %v1953_v40 = vadd.f32 1.0, %v4380_v37  ;;  %3570 = vmatpush3.bf16.msra.mxu0 %v4260_v33  ;;  %v4262_v35 = vld [vmem:[%s3175_s29 + $0x8] sm:$0xff]   ;;  %v4263_v36 = vld [vmem:[%s3175_s29 + $0x50] sm:$0xff]  }
 0x6f1   :  { %4393 = vrcp.f32 %v1954_v38  ;;  %v1955_v41 = vadd.f32 1.0, %v4382_v39  ;;  %3571 = vmatprep.subr.bf16.mxu0 %v4261_v34  ;;  %v4264_v37 = vld [vmem:[%s3175_s29 + $0x10] sm:$0xff]   ;;  %v4265_v38 = vld [vmem:[%s3175_s29 + $0x58] sm:$0xff]  }
 0x6f2   :  { %4395 = vrcp.f32 %v1953_v40  ;;  %v4266_v39 = vld [vmem:[%s3175_s29 + $0x18] sm:$0xff]   ;;  %v4267_v40 = vld [vmem:[%s3175_s29 + $0x60] sm:$0xff]  }
 0x6f3   :  { %4397 = vrcp.f32 %v1955_v41  ;;  %v4268_v41 = vld [vmem:[%s3175_s29 + $0x20] sm:$0xff]  }
 0x6f4   :  { %3572 = vmatpush3.bf16.msra.mxu0 %v4262_v35 }
 0x6f5   :  { %3573 = vmatprep.subr.bf16.mxu0 %v4263_v36 }
 0x6f6   :  { %v4384_v42 = vpop.eup %4383 }
 0x6f7   :  { %v4386_v43 = vpop.eup %4385  ;;  %v1972_v53 = vmul.f32 %v4384_v42, %v1873_v8  ;;  %v4219_v8 = vld [vmem:[%s4739_s2 + $0x124] ss:$8 sps:$4 sm:$0xff]  }
 0x6f8   :  { %v4388_v44 = vpop.eup %4387  ;;  %v4801_v56 = vmul.f32 %v4386_v43, %v1916_v9  ;;  %v4217_v9 = vld [vmem:[%s4739_s2 + $0x120] ss:$8 sps:$4 sm:$0xff]   ;;  %3574 = vmatpush3.bf16.msra.mxu0 %v4264_v37 }
 0x6f9   :  { %v4390_v48 = vpop.eup %4389  ;;  %v1973_v59 = vmul.f32 %v4388_v44, %v1875_v12  ;;  %v4225_v12 = vld [vmem:[%s4739_s2 + $0x144] ss:$8 sps:$4 sm:$0xff]   ;;  %3575 = vmatprep.subr.bf16.mxu0 %v4265_v38  ;;  %v4271_v44 = vld [vmem:[%s3175_s29 + $0x70] sm:$0xff]  }
 0x6fa   :  { %v4392_v51 = vpop.eup %4391  ;;  %v1975_v62 = vmul.f32 %v4390_v48, %v4798_v13  ;;  %v4223_v13 = vld [vmem:[%s4739_s2 + $0x140] ss:$8 sps:$4 sm:$0xff]   ;;  %v4272_v48 = vld [vmem:[%s3175_s29 + $0x30] sm:$0xff]  }
 0x6fb   :  { %v4394_v52 = vpop.eup %4393  ;;  %v1976_v54 = vmul.f32 %v4392_v51, %v1877_v18  ;;  %v4234_v18 = vld [vmem:[%s4739_s2 + $0x174] ss:$8 sps:$4 sm:$0xff]   ;;  %v4269_v42 = vld [vmem:[%s3175_s29 + $0x68] sm:$0xff]  }
 0x6fc   :  { %v4396_v55 = vpop.eup %4395  ;;  %v4803_v57 = vmul.f32 %v4394_v52, %v1920_v47  ;;  %v4232_v47 = vld [vmem:[%s4739_s2 + $0x170] ss:$8 sps:$4 sm:$0xff]   ;;  %3576 = vmatpush3.bf16.msra.mxu0 %v4266_v39  ;;  %v4270_v43 = vld [vmem:[%s3175_s29 + $0x28] sm:$0xff]  }
 0x6fd   :  { %v4398_v58 = vpop.eup %4397  ;;  %v2044_v60 = vpack.c.bf16 %v1976_v54, %v1972_v53  ;;  %v1977_v61 = vmul.f32 %v4396_v55, %v1879_v50  ;;  %v4243_v50 = vld [vmem:[%s4739_s2 + $0x1a4] ss:$8 sps:$4 sm:$0xff]   ;;  %3577 = vmatprep.subr.bf16.mxu0 %v4267_v40  ;;  %v4273_v51 = vld [vmem:[%s3175_s29 + $0x78] sm:$0xff]   ;;  %v2048_v53 = vld [vmem:[%s3174_s3] sm:$0x3] }
 0x6fe   :  { %v2046_v1 = vpack.c.bf16 %v4803_v57, %v4801_v56  ;;  %v1979_v2 = vmul.f32 %v4398_v58, %v1922_v22  ;;  %v4241_v22 = vld [vmem:[%s4739_s2 + $0x1a0] ss:$8 sps:$4 sm:$0xff]   ;;  %v4274_v52 = vld [vmem:[%s3175_s29 + $0x38] sm:$0xff]   ;;  %v2053_v54 = vrot.slane %v2048_v53, %v4587_v46  ;;  %v2057_v55 = vrot.slane %v2048_v53, %v4591_v49  ;;  %v4285_v53 = vld [vmem:[%s4870_s11 + $0x10] sm:$0xff]   ;;  %s4455_s2 = smov 27  }
 0x6ff   :  { %v2045_v3 = vpack.c.bf16 %v1977_v61, %v1973_v59  ;;  %s3182_s5 = sld [smem:[%s4950_s0 + %s4455_s2]]  }
 0x700   :  { %v2047_v5 = vpack.c.bf16 %v1979_v2, %v1975_v62  ;;  %3578 = vmatpush3.bf16.msra.mxu0 %v4268_v41 }
 0x701   :  { %2412 = vmatprep.mubr.bf16.mxu1 %v2045_v3  ;;  %3579 = vmatprep.subr.bf16.mxu0 %v4269_v42 }
 0x702   :  { %2413 = vmatmul.mubr.bf16.vlgmr.msra.gmra.mrb[20].mxu1 %v2044_v60 }
 0x703   :  { %2424 = vmatpush1.bf16.msra.mxu1 %v4211_v4  ;;  %2455 = vmatprep.mubr.bf16.mxu1 %v2047_v5 }
 0x704   :  { %2425 = vmatprep.subr.bf16.mxu1 %v4216_v6  ;;  %3580 = vmatpush3.bf16.msra.mxu0 %v4270_v43 }
 0x705   :  { %3581 = vmatprep.subr.bf16.mxu0 %v4271_v44 }
 0x707   :  { %2426 = vmatpush1.bf16.msra.mxu1 %v4214_v7 }
 0x708   :  { %2427 = vmatprep.subr.bf16.mxu1 %v4219_v8  ;;  %3582 = vmatpush3.bf16.msra.mxu0 %v4272_v48  ;;  %v4283_v48 = vld [vmem:[%s4870_s11] sm:$0xff]  }
 0x709   :  { %3583 = vmatprep.subr.bf16.mxu0 %v4273_v51 }
 0x70b   :  { %2428 = vmatpush1.bf16.msra.mxu1 %v4217_v9 }
 0x70c   :  { %2429 = vmatprep.subr.bf16.mxu1 %v4222_v10  ;;  %3584 = vmatpush3.bf16.msra.mxu0 %v4274_v52  ;;  %v4284_v52 = vld [vmem:[%s4870_s11 + $0x8] sm:$0xff]  }
 0x70d   :  { %3736 = vmatprep.subr.bf16.mxu0 %v4425_v0 }
 0x70f   :  { %2430 = vmatpush1.bf16.msra.mxu1 %v4220_v11 }
 0x710   :  { %2431 = vmatprep.subr.bf16.mxu1 %v4225_v12 }
 0x713   :  { %2432 = vmatpush1.bf16.msra.mxu1 %v4223_v13 }
 0x714   :  { %2433 = vmatprep.subr.bf16.mxu1 %v4228_v14 }
 0x717   :  { %2434 = vmatpush1.bf16.msra.mxu1 %v4226_v15 }
 0x718   :  { %2435 = vmatprep.subr.bf16.mxu1 %v4231_v16 }
 0x71b   :  { %2436 = vmatpush1.bf16.msra.mxu1 %v4229_v17 }
 0x71c   :  { %2437 = vmatprep.subr.bf16.mxu1 %v4234_v18 }
 0x71f   :  { %2438 = vmatpush1.bf16.msra.mxu1 %v4232_v47 }
 0x720   :  { %2439 = vmatprep.subr.bf16.mxu1 %v4237_v19 }
 0x723   :  { %2440 = vmatpush1.bf16.msra.mxu1 %v4235_v20 }
 0x724   :  { %2441 = vmatprep.subr.bf16.mxu1 %v4240_v21  ;;  %v4275_v21 = vld [vmem:[%s3177_s7] sm:$0xff]  }
 0x727   :  { %2442 = vmatpush1.bf16.msra.mxu1 %v4238_v45  ;;  %v4276_v45 = vld [vmem:[%s3177_s7 + $0x8] sm:$0xff]  }
 0x728   :  { %2443 = vmatprep.subr.bf16.mxu1 %v4243_v50  ;;  %v4277_v50 = vld [vmem:[%s3177_s7 + $0x10] sm:$0xff]  }
 0x72b   :  { %2444 = vmatpush1.bf16.msra.mxu1 %v4241_v22  ;;  %v4278_v22 = vld [vmem:[%s3177_s7 + $0x18] sm:$0xff]  }
 0x72c   :  { %2445 = vmatprep.subr.bf16.mxu1 %v4246_v23  ;;  %v4279_v23 = vld [vmem:[%s3177_s7 + $0x20] sm:$0xff]  }
 0x72f   :  { %2446 = vmatpush1.bf16.msra.mxu1 %v4244_v24  ;;  %v4280_v24 = vld [vmem:[%s3177_s7 + $0x28] sm:$0xff]  }
 0x730   :  { %2447 = vmatprep.subr.bf16.mxu1 %v4249_v25  ;;  %v4281_v25 = vld [vmem:[%s3177_s7 + $0x30] sm:$0xff]  }
 0x733   :  { %2448 = vmatpush1.bf16.msra.mxu1 %v4247_v26  ;;  %v4282_v26 = vld [vmem:[%s3177_s7 + $0x38] sm:$0xff]  }
 0x734   :  { %2449 = vmatprep.subr.bf16.mxu1 %v4252_v27 }
 0x737   :  { %2450 = vmatpush1.bf16.msra.mxu1 %v4250_v28  ;;  %v3437_v28 = vld [vmem:[%s3176_s15] ss:$0 sm:$0xff] }
 0x738   :  { %2451 = vmatprep.subr.bf16.mxu1 %v4255_v29 }
 0x73b   :  { %2452 = vmatpush1.bf16.msra.mxu1 %v4253_v30 }
 0x73c   :  { %2453 = vmatprep.subr.bf16.mxu1 %v4258_v31 }
 0x73f   :  { %2454 = vmatpush1.bf16.msra.mxu1 %v4256_v63 }
 0x740   :  { %3796 = vmatprep.subr.bf16.mxu1 %v4425_v0 }
 0x742   :  { %2456 = vmatmul.mubr.bf16.vlgmr.msra.gmra.mrb[20].mxu1 %v2046_v1 }
 0x743   :  { %3812 = vmatprep.mubr.msk.bf16.mxu1 %vm4427_vm1, %v4425_v0 }
 0x815   :  { %v2457_v56 = vpop.f32.mrb[20].mxu1 }
 0x816   :  { %v3900_v57 = vadd.f32 %v2457_v56, %v2053_v54  ;;  %v2459_v58 = vpop.f32.mrb[21].mxu1  ;;  %v4288_v56 = vld [vmem:[%s4870_s11 + $0x28] sm:$0xff]  }
 0x817   :  { %v3901_v59 = vadd.f32 %v2459_v58, %v2057_v55  ;;  %v2461_v60 = vpop.f32.mrb[22].mxu1  ;;  %v4290_v58 = vld [vmem:[%s4870_s11 + $0x38] sm:$0xff]  }
 0x818   :  { %v3433_v61 = vmul.f32 -1.442695, %v3900_v57  ;;  %v3902_v62 = vadd.f32 %v2461_v60, %v2053_v54  ;;  %v2463_v1 = vpop.f32.mrb[23].mxu1  ;;  %v4286_v54 = vld [vmem:[%s4870_s11 + $0x18] sm:$0xff]  }
 0x819   :  { %v3434_v2 = vmul.f32 -1.442695, %v3901_v59  ;;  %v3903_v3 = vadd.f32 %v2463_v1, %v2057_v55  ;;  %v4287_v55 = vld [vmem:[%s4870_s11 + $0x20] sm:$0xff]  }
 0x81a   :  { %4399 = vpow2.f32 %v3433_v61  ;;  %v3435_v4 = vmul.f32 -1.442695, %v3902_v62 }
 0x81b   :  { %4401 = vpow2.f32 %v3434_v2  ;;  %v3436_v5 = vmul.f32 -1.442695, %v3903_v3 }
 0x81c   :  { %4403 = vpow2.f32 %v3435_v4  ;;  %v4291_v4 = vld [vmem:[%s4896_s19] sm:$0xff]  }
 0x81d   :  { %4405 = vpow2.f32 %v3436_v5 }
 0x824   :  { %v4400_v6 = vpop.eup %4399 }
 0x825   :  { %v4402_v46 = vpop.eup %4401  ;;  %v2478_v7 = vadd.f32 1.0, %v4400_v6  ;;  %v4292_v6 = vld [vmem:[%s4896_s19 + $0x8] sm:$0xff]  }
 0x826   :  { %v4404_v49 = vpop.eup %4403  ;;  %v2479_v8 = vadd.f32 1.0, %v4402_v46  ;;  %v4293_v46 = vld [vmem:[%s4896_s19 + $0x10] sm:$0xff]  }
 0x827   :  { %v4406_v9 = vpop.eup %4405  ;;  %4407 = vrcp.f32 %v2478_v7  ;;  %v2480_v10 = vadd.f32 1.0, %v4404_v49  ;;  %v4294_v7 = vld [vmem:[%s4896_s19 + $0x18] sm:$0xff]   ;;  %v4295_v49 = vld [vmem:[%s4896_s19 + $0x20] sm:$0xff]  }
 0x828   :  { %4409 = vrcp.f32 %v2479_v8  ;;  %v2481_v11 = vadd.f32 1.0, %v4406_v9  ;;  %v4296_v8 = vld [vmem:[%s4896_s19 + $0x28] sm:$0xff]   ;;  %v4297_v9 = vld [vmem:[%s4896_s19 + $0x30] sm:$0xff]  }
 0x829   :  { %4411 = vrcp.f32 %v2480_v10  ;;  %v4298_v10 = vld [vmem:[%s4896_s19 + $0x38] sm:$0xff]  }
 0x82a   :  { %4413 = vrcp.f32 %v2481_v11  ;;  %v4299_v11 = vld [vmem:[%s4921_s27] sm:$0xff]  }
 0x82b   :  { %3797 = vmatpush3.bf16.msra.mxu1 %v4299_v11 }
 0x82c   :  { %3798 = vmatprep.subr.bf16.mxu1 %v4425_v0 }
 0x831   :  { %v4408_v12 = vpop.eup %4407 }
 0x832   :  { %v4410_v13 = vpop.eup %4409  ;;  %v2490_v16 = vmul.f32 %v4408_v12, %v3900_v57  ;;  %v4289_v57 = vld [vmem:[%s4870_s11 + $0x30] sm:$0xff]   ;;  %v4300_v12 = vld [vmem:[%s4921_s27 + $0x8] sm:$0xff]  }
 0x833   :  { %v4412_v14 = vpop.eup %4411  ;;  %v2491_v18 = vmul.f32 %v4410_v13, %v3901_v59  ;;  %v3456_v59 = vld [vmem:[%s3178_s23] ss:$0 sm:$0xff]  ;;  %3799 = vmatpush3.bf16.msra.mxu1 %v4300_v12  ;;  %v4301_v13 = vld [vmem:[%s4921_s27 + $0x10] sm:$0xff]  }
 0x834   :  { %v4414_v15 = vpop.eup %4413  ;;  %v2492_v17 = vmul.f32 %v4412_v14, %v3902_v62  ;;  %3800 = vmatprep.subr.bf16.mxu1 %v4425_v0  ;;  %v4302_v14 = vld [vmem:[%s4921_s27 + $0x18] sm:$0xff]  }
 0x835   :  { %v2493_v47 = vmul.f32 %v4414_v15, %v3903_v3  ;;  %v4303_v15 = vld [vmem:[%s4921_s27 + $0x20] sm:$0xff]  }
 0x836   :  { %v2526_v19 = vpack.c.bf16 %v2492_v17, %v2490_v16  ;;  %v4304_v16 = vld [vmem:[%s4921_s27 + $0x28] sm:$0xff]   ;;  %v3465_v17 = vld [vmem:[%s3180_s1] ss:$0 sm:$0xff] }
 0x837   :  { %v2527_v20 = vpack.c.bf16 %v2493_v47, %v2491_v18  ;;  %3801 = vmatpush3.bf16.msra.mxu1 %v4301_v13 }
 0x838   :  { %3802 = vmatprep.subr.bf16.mxu1 %v4425_v0 }
 0x839   :  { %2663 = vmatprep.mubr.bf16.mxu0 %v2527_v20 }
 0x83a   :  { %2664 = vmatmul.mubr.bf16.vlgmr.msra.gmra.mrb[16].mxu0 %v2526_v19 }
 0x83b   :  { %3752 = vmatprep.mubr.msk.bf16.mxu0 %vm4427_vm1, %v4425_v0  ;;  %3737 = vmatpush3.bf16.msra.mxu0 %v4275_v21 }
 0x83c   :  { %3738 = vmatprep.subr.bf16.mxu0 %v4425_v0  ;;  %3803 = vmatpush3.bf16.msra.mxu1 %v4302_v14 }
 0x83d   :  { %3804 = vmatprep.subr.bf16.mxu1 %v4425_v0 }
 0x83f   :  { %3739 = vmatpush3.bf16.msra.mxu0 %v4276_v45 }
 0x840   :  { %3740 = vmatprep.subr.bf16.mxu0 %v4425_v0  ;;  %3805 = vmatpush3.bf16.msra.mxu1 %v4303_v15 }
 0x841   :  { %3806 = vmatprep.subr.bf16.mxu1 %v4425_v0 }
 0x843   :  { %3741 = vmatpush3.bf16.msra.mxu0 %v4277_v50 }
 0x844   :  { %3742 = vmatprep.subr.bf16.mxu0 %v4425_v0  ;;  %3807 = vmatpush3.bf16.msra.mxu1 %v4304_v16 }
 0x845   :  { %3808 = vmatprep.subr.bf16.mxu1 %v4425_v0 }
 0x847   :  { %3743 = vmatpush3.bf16.msra.mxu0 %v4278_v22 }
 0x848   :  { %3744 = vmatprep.subr.bf16.mxu0 %v4425_v0 }
 0x84b   :  { %3745 = vmatpush3.bf16.msra.mxu0 %v4279_v23 }
 0x84c   :  { %3746 = vmatprep.subr.bf16.mxu0 %v4425_v0 }
 0x84f   :  { %3747 = vmatpush3.bf16.msra.mxu0 %v4280_v24  ;;  %v4305_v24 = vld [vmem:[%s4921_s27 + $0x30] sm:$0xff]  }
 0x850   :  { %3748 = vmatprep.subr.bf16.mxu0 %v4425_v0  ;;  %3809 = vmatpush3.bf16.msra.mxu1 %v4305_v24 }
 0x851   :  { %3810 = vmatprep.subr.bf16.mxu1 %v4425_v0 }
 0x853   :  { %3749 = vmatpush3.bf16.msra.mxu0 %v4281_v25  ;;  %v4306_v25 = vld [vmem:[%s4921_s27 + $0x38] sm:$0xff]  }
 0x854   :  { %3750 = vmatprep.subr.bf16.mxu0 %v4425_v0  ;;  %3811 = vmatpush3.bf16.msra.mxu1 %v4306_v25 }
 0x857   :  { %3751 = vmatpush3.bf16.msra.mxu0 %v4282_v26  ;;  %v3474_v26 = vld [vmem:[%s3182_s5] ss:$0 sm:$0xff] }
 0x858   :  { %3756 = vmatprep.subr.bf16.mxu0 %v4425_v0 }
 0x90d   :  { %v3585_v27 = vpop.f32.mrb[16].mxu0 }
 0x90e   :  { %v3586_v29 = vpop.f32.mrb[17].mxu0 }
 0x90f   :  { %v3587_v30 = vadd.f32 %v3586_v29, %v3585_v27  ;;  %v3588_v31 = vpop.f32.mrb[18].mxu0 }
 0x910   :  { %v3589_v63 = vpop.f32.mrb[19].mxu0 }
 0x911   :  { %v2666_v32 = vadd.f32 %v3587_v30, %v3437_v28  ;;  %v3590_v33 = vadd.f32 %v3589_v63, %v3588_v31 }
 0x913   :  { %v3454_v34 = vmul.f32 -1.442695, %v2666_v32  ;;  %v2669_v35 = vadd.f32 %v3590_v33, %v3437_v28 }
 0x915   :  { %4415 = vpow2.f32 %v3454_v34  ;;  %v3455_v36 = vmul.f32 -1.442695, %v2669_v35 }
 0x917   :  { %4417 = vpow2.f32 %v3455_v36 }
 0x91f   :  { %v4416_v37 = vpop.eup %4415 }
 0x920   :  { %v2678_v38 = vadd.f32 1.0, %v4416_v37 }
 0x921   :  { %v4418_v39 = vpop.eup %4417 }
 0x922   :  { %4419 = vrcp.f32 %v2678_v38  ;;  %v2679_v40 = vadd.f32 1.0, %v4418_v39 }
 0x924   :  { %4421 = vrcp.f32 %v2679_v40 }
 0x92c   :  { %v4420_v41 = vpop.eup %4419 }
 0x92d   :  { %v2684_v43 = vmul.f32 %v4420_v41, %v2666_v32 }
 0x92e   :  { %v4422_v42 = vpop.eup %4421 }
 0x92f   :  { %v2685_v44 = vmul.f32 %v4422_v42, %v2669_v35 }
 0x931   :  { %v2702_v51 = vpack.c.bf16 %v2685_v44, %v2684_v43 }
 0x933   :  { %3753 = vmatmul.mubr.bf16.vlgmr.msra.gmra.mrb[20].mxu0 %v2702_v51 }
 0x934   :  { %3757 = vmatpush3.bf16.msra.mxu0 %v4283_v48  ;;  %3772 = vmatprep.mubr.msk.bf16.mxu0 %vm4427_vm1, %v4425_v0 }
 0x935   :  { %3758 = vmatprep.subr.bf16.mxu0 %v4425_v0 }
 0x938   :  { %3759 = vmatpush3.bf16.msra.mxu0 %v4284_v52 }
 0x939   :  { %3760 = vmatprep.subr.bf16.mxu0 %v4425_v0 }
 0x93c   :  { %3761 = vmatpush3.bf16.msra.mxu0 %v4285_v53 }
 0x93d   :  { %3762 = vmatprep.subr.bf16.mxu0 %v4425_v0 }
 0x940   :  { %3763 = vmatpush3.bf16.msra.mxu0 %v4286_v54 }
 0x941   :  { %3764 = vmatprep.subr.bf16.mxu0 %v4425_v0 }
 0x944   :  { %3765 = vmatpush3.bf16.msra.mxu0 %v4287_v55 }
 0x945   :  { %3766 = vmatprep.subr.bf16.mxu0 %v4425_v0 }
 0x948   :  { %3767 = vmatpush3.bf16.msra.mxu0 %v4288_v56 }
 0x949   :  { %3768 = vmatprep.subr.bf16.mxu0 %v4425_v0 }
 0x94c   :  { %3769 = vmatpush3.bf16.msra.mxu0 %v4289_v57 }
 0x94d   :  { %3770 = vmatprep.subr.bf16.mxu0 %v4425_v0 }
 0x950   :  { %3771 = vmatpush3.bf16.msra.mxu0 %v4290_v58 }
 0x951   :  { %3776 = vmatprep.subr.bf16.mxu0 %v4425_v0 }
 0xa06   :  { %v2792_v60 = vpop.f32.mrb[20].mxu0 }
 0xa07   :  { %v3754_v61 = vpop.f32.mrb[21].mxu0  ;;  %v2793_v1 = vadd.f32 %v3456_v59, %v2792_v60 }
 0xa08   :  { %v2795_v62 = vpop.f32.mrb[22].mxu0 }
 0xa09   :  { %v2796_v2 = vadd.f32 %v3456_v59, %v2795_v62  ;;  %v3755_v3 = vpop.f32.mrb[23].mxu0 }
 0xa0b   :  { %v2815_v5 = vpack.c.bf16 %v2796_v2, %v2793_v1 }
 0xa0d   :  { %3773 = vmatmul.mubr.bf16.vlgmr.msra.gmra.mrb[24].mxu0 %v2815_v5 }
 0xa0e   :  { %3777 = vmatpush3.bf16.msra.mxu0 %v4291_v4  ;;  %3792 = vmatprep.mubr.msk.bf16.mxu0 %vm4427_vm1, %v4425_v0 }
 0xa0f   :  { %3778 = vmatprep.subr.bf16.mxu0 %v4425_v0 }
 0xa12   :  { %3779 = vmatpush3.bf16.msra.mxu0 %v4292_v6 }
 0xa13   :  { %3780 = vmatprep.subr.bf16.mxu0 %v4425_v0 }
 0xa16   :  { %3781 = vmatpush3.bf16.msra.mxu0 %v4293_v46 }
 0xa17   :  { %3782 = vmatprep.subr.bf16.mxu0 %v4425_v0 }
 0xa1a   :  { %3783 = vmatpush3.bf16.msra.mxu0 %v4294_v7 }
 0xa1b   :  { %3784 = vmatprep.subr.bf16.mxu0 %v4425_v0 }
 0xa1e   :  { %3785 = vmatpush3.bf16.msra.mxu0 %v4295_v49 }
 0xa1f   :  { %3786 = vmatprep.subr.bf16.mxu0 %v4425_v0 }
 0xa22   :  { %3787 = vmatpush3.bf16.msra.mxu0 %v4296_v8 }
 0xa23   :  { %3788 = vmatprep.subr.bf16.mxu0 %v4425_v0 }
 0xa26   :  { %3789 = vmatpush3.bf16.msra.mxu0 %v4297_v9 }
 0xa27   :  { %3790 = vmatprep.subr.bf16.mxu0 %v4425_v0  ;;  %v3483_v0 = vld [vmem:[%s3184_s9] ss:$0 sm:$0xff] }
 0xa2a   :  { %3791 = vmatpush3.bf16.msra.mxu0 %v4298_v10 }
 0xae0   :  { %v2905_v18 = vpop.f32.mrb[24].mxu0 }
 0xae1   :  { %v2906_v47 = vadd.f32 %v3465_v17, %v2905_v18  ;;  %v3774_v19 = vpop.f32.mrb[25].mxu0 }
 0xae2   :  { %v2908_v20 = vpop.f32.mrb[26].mxu0 }
 0xae3   :  { %v2909_v21 = vadd.f32 %v3465_v17, %v2908_v20  ;;  %v3775_v45 = vpop.f32.mrb[27].mxu0  ;;  %v2912_v50 = vmax.f32 %v2906_v47, 0.0 }
 0xae5   :  { %v2913_v22 = vmax.f32 %v2909_v21, 0.0 }
 0xae7   :  { %v2930_v23 = vpack.c.bf16 %v2913_v22, %v2912_v50 }
 0xae9   :  { %3793 = vmatmul.mubr.bf16.vlgmr.msra.gmra.mrb[28].mxu0 %v2930_v23 }
 0xbbc   :  { %v3020_v27 = vpop.f32.mrb[28].mxu0 }
 0xbbd   :  { %v3021_v28 = vadd.f32 %v3474_v26, %v3020_v27  ;;  %v3794_v29 = vpop.f32.mrb[29].mxu0 }
 0xbbe   :  { %v3023_v30 = vpop.f32.mrb[30].mxu0 }
 0xbbf   :  { %v3024_v31 = vadd.f32 %v3474_v26, %v3023_v30  ;;  %v3795_v63 = vpop.f32.mrb[31].mxu0  ;;  %v3027_v32 = vmax.f32 %v3021_v28, 0.0 }
 0xbc1   :  { %v3028_v33 = vmax.f32 %v3024_v31, 0.0 }
 0xbc3   :  { %v3045_v34 = vpack.c.bf16 %v3028_v33, %v3027_v32 }
 0xbc5   :  { %3813 = vmatmul.mubr.bf16.vlgmr.msra.gmra.mrb[24].mxu1 %v3045_v34 }
 0xc98   :  { %v3135_v35 = vpop.f32.mrb[24].mxu1 }
 0xc99   :  { %v3136_v36 = vadd.f32 %v3483_v0, %v3135_v35  ;;  %v3814_v37 = vpop.f32.mrb[25].mxu1 }
 0xc9a   :  { %v3138_v38 = vpop.f32.mrb[26].mxu1 }
 0xc9b   :  { %3142 = vst [vmem:[%s3185_s13] sm:$0xff] %v3136_v36  ;;  %v3139_v39 = vadd.f32 %v3483_v0, %v3138_v38  ;;  %v3815_v40 = vpop.f32.mrb[27].mxu1 }
 0xc9d   :  { %3143 = vst [vmem:[%s3185_s13 + $0x8] sm:$0xff] %v3139_v39 }

</bundles_post_ra>
